<compile_context>
chip_gen: v5e
topology: v5e:2x2
jax: 0.10.0
libtpu: 0.0.40
codegen_flags: <defaults>
</compile_context>

<pallas_src>
import functools

import jax
import jax.numpy as jnp
from jax.experimental import pallas as pl
from jax.experimental.pallas import tpu as pltpu


def _round_up(x, m):
    return (x + m - 1) // m * m


# --------------------------------------------------------------------------- #
# Kernel: one Chebyshev order of the fused GCLSTM forward
# --------------------------------------------------------------------------- #
def gclstm_kernel(L_ref, xcat_ref, c_ref, bcat_ref, w_ref,
                  h_out_ref, c_out_ref,
                  z_ref, acc_ref, *, hidden_pad, store_dtype):
    order = pl.program_id(0)           # Chebyshev order (strictly serial recurrence)
    num_orders = pl.num_programs(0)

    w = w_ref[0]                       # (Dp, GHp) fused gate weights for this order

    def mxu(a, b):
        # operands already in their storage dtype (bf16 or f32); always f32 accumulate
        return jnp.dot(a, b, preferred_element_type=jnp.float32)

    # ---- order 0: Z0 = [h | x]; acc = bias + Z0 @ W0 (no identity matmul) ----
    @pl.when(order == 0)
    def _():
        z0 = xcat_ref[...]
        z_ref[0] = z0
        acc_ref[...] = bcat_ref[...] + mxu(z0, w)

    # ---- order 1: Z1 = L @ Z0; acc += Z1 @ W1 ----
    @pl.when(order == 1)
    def _():
        z1 = mxu(L_ref[...], z_ref[0]).astype(store_dtype)
        z_ref[1] = z1
        acc_ref[...] = acc_ref[...] + mxu(z1, w)

    # ---- order >= 2: Z_i = 2 L Z_{i-1} - Z_{i-2}, ping-pong on slot parity ----
    def cheb_step(prev_slot, dst_slot):
        z_new = (2.0 * mxu(L_ref[...], z_ref[prev_slot])
                 - z_ref[dst_slot].astype(jnp.float32)).astype(store_dtype)
        z_ref[dst_slot] = z_new
        acc_ref[...] = acc_ref[...] + mxu(z_new, w)

    @pl.when((order >= 2) & (order % 2 == 0))
    def _():
        cheb_step(1, 0)

    @pl.when((order >= 2) & (order % 2 == 1))
    def _():
        cheb_step(0, 1)

    # ---- last order: fused LSTM gate math; outputs written exactly once ----
    @pl.when(order == num_orders - 1)
    def _():
        Hp = hidden_pad
        a = acc_ref[...]
        f_g = jax.nn.sigmoid(a[:, 0 * Hp:1 * Hp])
        i_g = jax.nn.sigmoid(a[:, 1 * Hp:2 * Hp])
        o_g = jax.nn.sigmoid(a[:, 2 * Hp:3 * Hp])
        g_g = jnp.tanh(a[:, 3 * Hp:4 * Hp])
        c_new = i_g * g_g + f_g * c_ref[...]
        c_out_ref[...] = c_new
        h_out_ref[...] = o_g * jnp.tanh(c_new)


# --------------------------------------------------------------------------- #
# Host-side parameter packing (free layout plumbing)
# --------------------------------------------------------------------------- #
def pack_params(x, h, Wh, Wx, b, store_dtype):
    """Fuse [h|x] plus the 4 gates' weights/bias into lane-dense, pre-transposed blocks.

    xcat: (Np, Dp)        Dp  = round_up(H+Din, 128), cols [h | x | 0-pad], rows padded
    wcat: (k, Dp, GHp)    GHp = 4*Hp, Hp = round_up(H, 128); gate g occupies lane-aligned
                          cols [g*Hp : g*Hp+H]; rows 0:H = Wh[g,i].T, rows H:H+Din = Wx[g,i].T
    bcat: (Np, GHp)       per-node bias, gates stacked lane-aligned
    """
    N, H = h.shape
    Din = x.shape[1]
    D = H + Din
    Dp = _round_up(D, 128)
    Hp = _round_up(H, 128)
    GHp = 4 * Hp
    k = Wh.shape[1]
    Np = _round_up(N, 16)              # sublane-safe for both f32 (8) and bf16 (16)

    xcat = (jnp.zeros((Np, Dp), jnp.float32)
            .at[:N, :H].set(h)
            .at[:N, H:D].set(x))

    wcat = jnp.zeros((k, Dp, GHp), jnp.float32)
    bcat = jnp.zeros((Np, GHp), jnp.float32)
    for g in range(4):                                    # gate order: f, i, o, c
        wcat = wcat.at[:, :H, g * Hp:g * Hp + H].set(jnp.transpose(Wh[g], (0, 2, 1)))
        wcat = wcat.at[:, H:D, g * Hp:g * Hp + H].set(jnp.transpose(Wx[g], (0, 2, 1)))
        bcat = bcat.at[:N, g * Hp:g * Hp + H].set(b[g])
    return xcat.astype(store_dtype), wcat.astype(store_dtype), bcat, Hp, Np


def _vmem_capacity_bytes():
    try:
        return int(pltpu.get_tpu_info().vmem_capacity_bytes)
    except Exception:
        return 64 << 20   # conservative default (v7x per-TC)


@functools.partial(jax.jit, static_argnames=("k", "use_bf16"))
def gclstm_forward(Lap, x, h, c, Wh, Wx, b, *, k, use_bf16=False):
    N, H = h.shape
    store_dtype = jnp.bfloat16 if use_bf16 else jnp.float32
    xcat, wcat, bcat, Hp, Np = pack_params(x, h, Wh, Wx, b, store_dtype)
    Dp = xcat.shape[1]
    GHp = wcat.shape[2]

    Lap_p = jnp.zeros((Np, Np), jnp.float32).at[:N, :N].set(Lap).astype(store_dtype)
    c_p = jnp.zeros((Np, Hp), jnp.float32).at[:N, :H].set(c)

    # Derive the VMEM budget from actual buffer sizes (double-buffered pipeline blocks)
    # and the chip's capacity instead of hard-coding.
    bs = 2 if use_bf16 else 4
    vmem_needed = (
        2 * Np * Np * bs         # L (resident)
        + 2 * Np * Dp * bs       # [h|x]
        + 2 * Np * Hp * 4        # c
        + 2 * Np * GHp * 4       # fused bias
        + 2 * Dp * GHp * bs      # per-order fused weights (streamed)
        + 2 * 2 * Np * Hp * 4    # h_out, c_out
        + 2 * Np * Dp * bs       # Z ping-pong scratch
        + Np * GHp * 4           # fused pre-activation accumulator
    )
    cap = _vmem_capacity_bytes()
    vmem_limit = int(min(max(vmem_needed + (4 << 20), 32 << 20), cap - (8 << 20)))
    # TODO(synk): for N large enough that the resident L / full-N Z no longer fit the
    # target generation's VMEM (64 MiB v7x, 128 MiB v5e/v6e), fall back to a row-tiled
    # variant (emit_pipeline over row tiles inside each order).

    kern = functools.partial(gclstm_kernel, hidden_pad=Hp, store_dtype=store_dtype)

    h_pad, c_pad = pl.pallas_call(
        kern,
        out_shape=(jax.ShapeDtypeStruct((Np, Hp), jnp.float32),
                   jax.ShapeDtypeStruct((Np, Hp), jnp.float32)),
        grid_spec=pltpu.PrefetchScalarGridSpec(
            num_scalar_prefetch=0,
            grid=(k,),
            in_specs=[
                pl.BlockSpec((Np, Np), lambda o: (0, 0)),         # L: fetched once, resident
                pl.BlockSpec((Np, Dp), lambda o: (0, 0)),         # [h|x]: fetched once
                pl.BlockSpec((Np, Hp), lambda o: (0, 0)),         # c: fetched once
                pl.BlockSpec((Np, GHp), lambda o: (0, 0)),        # fused bias: fetched once
                pl.BlockSpec((1, Dp, GHp), lambda o: (o, 0, 0)),  # this order's weights (streamed)
            ],
            out_specs=(
                pl.BlockSpec((Np, Hp), lambda o: (0, 0)),         # h_out: written back once
                pl.BlockSpec((Np, Hp), lambda o: (0, 0)),         # c_out: written back once
            ),
            scratch_shapes=[
                pltpu.VMEM((2, Np, Dp), store_dtype),             # Z_{i-1}/Z_{i-2} ping-pong
                pltpu.VMEM((Np, GHp), jnp.float32),               # fused gate pre-activations
            ],
        ),
        compiler_params=pltpu.CompilerParams(
            # The Chebyshev-order axis is a true recurrence: strictly serial.
            # TODO(synk): v7x 2-TC split of the node rows would need VMEM_SHARED Z/acc
            # plus a core_barrier between orders; kept single-core here.
            dimension_semantics=("arbitrary",),
            vmem_limit_bytes=vmem_limit,
        ),
    )(Lap_p, xcat, c_p, bcat, wcat)
    return h_pad[:N, :H], c_pad[:N, :H]


# --------------------------------------------------------------------------- #
# Pure-JAX references
# --------------------------------------------------------------------------- #
_HI = jax.lax.Precision.HIGHEST


def _cheb(K, L):
    if K == 0:
        return jnp.eye(L.shape[0], dtype=L.dtype)
    if K == 1:
        return L
    return 2.0 * jnp.matmul(L, _cheb(K - 1, L), precision=_HI) - _cheb(K - 2, L)


def _graph_conv_ref(X, W, L):
    conv = jnp.zeros((L.shape[0], W.shape[1]), jnp.float32)
    for i in range(W.shape[0]):
        t = jnp.matmul(_cheb(i, L), X, precision=_HI)
        conv = conv + jnp.matmul(t, W[i].T, precision=_HI)
    return conv


def gclstm_torch_ref(Lap, x, h, c, Wh, Wx, b):
    """Direct mirror of the PyTorch GCLSTM.forward (explicit Chebyshev matrices)."""
    f = jax.nn.sigmoid(_graph_conv_ref(h, Wh[0], Lap) + _graph_conv_ref(x, Wx[0], Lap) + b[0])
    i = jax.nn.sigmoid(_graph_conv_ref(h, Wh[1], Lap) + _graph_conv_ref(x, Wx[1], Lap) + b[1])
    o = jax.nn.sigmoid(_graph_conv_ref(h, Wh[2], Lap) + _graph_conv_ref(x, Wx[2], Lap) + b[2])
    c_new = i * jnp.tanh(_graph_conv_ref(h, Wh[3], Lap) + _graph_conv_ref(x, Wx[3], Lap) + b[3]) + f * c
    h_new = o * jnp.tanh(c_new)
    return h_new, c_new


def gclstm_fused_ref(Lap_p, xcat, c_p, bcat, wcat, Hp):
    """Same algebra and packed layout as the kernel (Z recursion + fused gates)."""
    mm = lambda a, bb: jnp.matmul(a, bb, precision=_HI)
    k = wcat.shape[0]
    acc = bcat + mm(xcat, wcat[0])
    z_prev2 = xcat
    z_prev = None
    if k > 1:
        z_prev = mm(Lap_p, xcat)
        acc = acc + mm(z_prev, wcat[1])
    for i in range(2, k):
        z_new = 2.0 * mm(Lap_p, z_prev) - z_prev2
        acc = acc + mm(z_new, wcat[i])
        z_prev2, z_prev = z_prev, z_new
    f = jax.nn.sigmoid(acc[:, 0 * Hp:1 * Hp])
    ig = jax.nn.sigmoid(acc[:, 1 * Hp:2 * Hp])
    o = jax.nn.sigmoid(acc[:, 2 * Hp:3 * Hp])
    g = jnp.tanh(acc[:, 3 * Hp:4 * Hp])
    c_new = ig * g + f * c_p
    h_new = o * jnp.tanh(c_new)
    return h_new, c_new


# --------------------------------------------------------------------------- #
if __name__ == "__main__":
    # module-consistent small sizes: N nodes, input_size, hidden_size, k hops
    N, Din, H, K = 16, 8, 32, 4

    key = jax.random.PRNGKey(0)
    keys = jax.random.split(key, 16)
    bound = (1.0 / Din) ** 0.5
    uni = lambda kk, shape: jax.random.uniform(kk, shape, jnp.float32, -bound, bound)

    # stacked parameters for the 4 gates [f, i, o, c]
    Wh = jnp.stack([uni(keys[j], (K, H, H)) for j in range(4)])        # (4,K,H,H)
    Wx = jnp.stack([uni(keys[4 + j], (K, H, Din)) for j in range(4)])  # (4,K,H,Din)
    b = jnp.stack([uni(keys[8 + j], (N, H)) for j in range(4)])        # (4,N,H)

    x = jax.random.normal(keys[12], (N, Din), jnp.float32)
    h = jax.random.normal(keys[13], (N, H), jnp.float32)
    c = jax.random.normal(keys[14], (N, H), jnp.float32)

    # sparse Laplacian description (GCLSTM.pos / GCLSTM.Lap_nonze) -> dense scatter (glue).
    # rescaled ring-graph Laplacian: zero diagonal, -0.5 per neighbour, eigenvalues in [-1,1].
    rows, cols, vals = [], [], []
    for n in range(N):
        rows += [n, n, n]
        cols += [n, (n + 1) % N, (n - 1) % N]
        vals += [0.0, -0.5, -0.5]
    Lap = jnp.zeros((N, N), jnp.float32).at[jnp.array(rows), jnp.array(cols)].set(
        jnp.array(vals, jnp.float32))

    # ---- Pallas kernel, f32 path ----
    h_new, c_new = gclstm_forward(Lap, x, h, c, Wh, Wx, b, k=K)
    jax.block_until_ready((h_new, c_new))

    # kernel-correctness check vs a plain-JAX reference with the same fused algebra/layout
    xcat, wcat, bcat, Hp, Np = pack_params(x, h, Wh, Wx, b, jnp.float32)
    Lap_p = jnp.zeros((Np, Np), jnp.float32).at[:N, :N].set(Lap)
    c_p = jnp.zeros((Np, Hp), jnp.float32).at[:N, :H].set(c)
    h_f, c_f = gclstm_fused_ref(Lap_p, xcat, c_p, bcat, wcat, Hp)
    h_f, c_f = h_f[:N, :H], c_f[:N, :H]
    assert jnp.allclose(h_new, h_f, atol=1e-2, rtol=1e-2), "h mismatch vs fused reference"
    assert jnp.allclose(c_new, c_f, atol=1e-2, rtol=1e-2), "c mismatch vs fused reference"

    # parameter-packing / gate-ordering check vs the direct PyTorch-style reference.
    # Looser tolerance: the formulations associate matmuls differently; only O(1)
    # layout bugs are meaningful here.
    h_t, c_t = gclstm_torch_ref(Lap, x, h, c, Wh, Wx, b)
    assert jnp.allclose(h_new, h_t, atol=2e-1, rtol=1e-1), "h mismatch vs module reference"
    assert jnp.allclose(c_new, c_t, atol=2e-1, rtol=1e-1), "c mismatch vs module reference"

    # ---- storage-level bf16 path (L / Z / W held in bf16, f32 accumulation) ----
    h_bf, c_bf = gclstm_forward(Lap, x, h, c, Wh, Wx, b, k=K, use_bf16=True)
    jax.block_until_ready((h_bf, c_bf))
    assert bool(jnp.all(jnp.isfinite(h_bf))) and bool(jnp.all(jnp.isfinite(c_bf)))
    assert float(jnp.max(jnp.abs(h_bf - h_f))) < 0.15, "bf16 path diverged (h)"
    assert float(jnp.max(jnp.abs(c_bf - c_f))) < 0.15, "bf16 path diverged (c)"

    print("KERNEL_OK")
</pallas_src>

<mosaic_0001>
module attributes {stable_mosaic.version = 11 : i64} {
  func.func @gclstm_kernel(%arg0: i32, %arg1: memref<16x16xf32, #tpu.memory_space<vmem>>, %arg2: memref<16x128xf32, #tpu.memory_space<vmem>>, %arg3: memref<16x128xf32, #tpu.memory_space<vmem>>, %arg4: memref<16x512xf32, #tpu.memory_space<vmem>>, %arg5: memref<1x128x512xf32, #tpu.memory_space<vmem>>, %arg6: memref<16x128xf32, #tpu.memory_space<vmem>>, %arg7: memref<16x128xf32, #tpu.memory_space<vmem>>, %arg8: memref<2x16x128xf32, #tpu.memory_space<vmem>>, %arg9: memref<16x512xf32, #tpu.memory_space<vmem>>) attributes {dimension_semantics = [#tpu.dimension_semantics<arbitrary>], iteration_bounds = array<i64: 4>, scalar_prefetch = 0 : i64, scratch_operands = 2 : i64, tpu.core_type = #tpu.core_type<tc>, window_params = [{pipeline_mode = #tpu.pipeline_mode<synchronous>, transform_indices = @transform_0, window_bounds = array<i64: 16, 16>}, {pipeline_mode = #tpu.pipeline_mode<synchronous>, transform_indices = @transform_1, window_bounds = array<i64: 16, 128>}, {pipeline_mode = #tpu.pipeline_mode<synchronous>, transform_indices = @transform_2, window_bounds = array<i64: 16, 128>}, {pipeline_mode = #tpu.pipeline_mode<synchronous>, transform_indices = @transform_3, window_bounds = array<i64: 16, 512>}, {transform_indices = @transform_4, window_bounds = array<i64: 1, 128, 512>}, {pipeline_mode = #tpu.pipeline_mode<synchronous>, transform_indices = @transform_5, window_bounds = array<i64: 16, 128>}, {pipeline_mode = #tpu.pipeline_mode<synchronous>, transform_indices = @transform_6, window_bounds = array<i64: 16, 128>}]} {
    %c0 = arith.constant 0 : index
    %c0_0 = arith.constant 0 : index
    %c0_1 = arith.constant 0 : index
    %0 = vector.load %arg5[%c0, %c0_0, %c0_1] : memref<1x128x512xf32, #tpu.memory_space<vmem>>, vector<1x128x512xf32>
    %1 = vector.shape_cast %0 : vector<1x128x512xf32> to vector<128x512xf32>
    %c0_i32 = arith.constant 0 : i32
    %2 = arith.cmpi eq, %arg0, %c0_i32 : i32
    %3 = arith.extui %2 : i1 to i32
    %c0_i32_2 = arith.constant 0 : i32
    %4 = arith.cmpi ne, %3, %c0_i32_2 : i32
    scf.if %4 {
      %c0_22 = arith.constant 0 : index
      %c0_23 = arith.constant 0 : index
      %41 = vector.load %arg2[%c0_22, %c0_23] : memref<16x128xf32, #tpu.memory_space<vmem>>, vector<16x128xf32>
      %c0_24 = arith.constant 0 : index
      %c0_25 = arith.constant 0 : index
      %c0_26 = arith.constant 0 : index
      %42 = vector.load %arg8[%c0_24, %c0_25, %c0_26] : memref<2x16x128xf32, #tpu.memory_space<vmem>>, vector<1x16x128xf32>
      %43 = vector.shape_cast %42 : vector<1x16x128xf32> to vector<16x128xf32>
      %44 = vector.shape_cast %41 : vector<16x128xf32> to vector<1x16x128xf32>
      tpu.vector_store %arg8[%c0_24, %c0_25, %c0_26], %44 {strides = array<i32>} : memref<2x16x128xf32, #tpu.memory_space<vmem>>, vector<1x16x128xf32>,
      %c0_27 = arith.constant 0 : index
      %c0_28 = arith.constant 0 : index
      %45 = vector.load %arg4[%c0_27, %c0_28] : memref<16x512xf32, #tpu.memory_space<vmem>>, vector<16x512xf32>
      %cst = arith.constant dense<0.000000e+00> : vector<16x512xf32>
      %46 = tpu.matmul %41, %1, %cst {dimension_numbers = #tpu.dot_dimension_numbers<[1], [0], [0], [1], [0, 0, 1, 1], [], []>} : vector<16x128xf32>, vector<128x512xf32>, vector<16x512xf32> -> vector<16x512xf32>
      %47 = arith.addf %45, %46 : vector<16x512xf32>
      %c0_29 = arith.constant 0 : index
      %c0_30 = arith.constant 0 : index
      %48 = vector.load %arg9[%c0_29, %c0_30] : memref<16x512xf32, #tpu.memory_space<vmem>>, vector<16x512xf32>
      tpu.vector_store %arg9[%c0_29, %c0_30], %47 {strides = array<i32>} : memref<16x512xf32, #tpu.memory_space<vmem>>, vector<16x512xf32>,
    } else {
    }
    %c1_i32 = arith.constant 1 : i32
    %5 = arith.cmpi eq, %arg0, %c1_i32 : i32
    %6 = arith.extui %5 : i1 to i32
    %c0_i32_3 = arith.constant 0 : i32
    %7 = arith.cmpi ne, %6, %c0_i32_3 : i32
    scf.if %7 {
      %c0_22 = arith.constant 0 : index
      %c0_23 = arith.constant 0 : index
      %41 = vector.load %arg1[%c0_22, %c0_23] : memref<16x16xf32, #tpu.memory_space<vmem>>, vector<16x16xf32>
      %c0_24 = arith.constant 0 : index
      %c0_25 = arith.constant 0 : index
      %c0_26 = arith.constant 0 : index
      %42 = vector.load %arg8[%c0_24, %c0_25, %c0_26] : memref<2x16x128xf32, #tpu.memory_space<vmem>>, vector<1x16x128xf32>
      %43 = vector.shape_cast %42 : vector<1x16x128xf32> to vector<16x128xf32>
      %cst = arith.constant dense<0.000000e+00> : vector<16x128xf32>
      %44 = tpu.matmul %41, %43, %cst {dimension_numbers = #tpu.dot_dimension_numbers<[1], [0], [0], [1], [0, 0, 1, 1], [], []>} : vector<16x16xf32>, vector<16x128xf32>, vector<16x128xf32> -> vector<16x128xf32>
      %c1 = arith.constant 1 : index
      %c0_27 = arith.constant 0 : index
      %c0_28 = arith.constant 0 : index
      %45 = vector.load %arg8[%c1, %c0_27, %c0_28] : memref<2x16x128xf32, #tpu.memory_space<vmem>>, vector<1x16x128xf32>
      %46 = vector.shape_cast %45 : vector<1x16x128xf32> to vector<16x128xf32>
      %47 = vector.shape_cast %44 : vector<16x128xf32> to vector<1x16x128xf32>
      tpu.vector_store %arg8[%c1, %c0_27, %c0_28], %47 {strides = array<i32>} : memref<2x16x128xf32, #tpu.memory_space<vmem>>, vector<1x16x128xf32>,
      %c0_29 = arith.constant 0 : index
      %c0_30 = arith.constant 0 : index
      %48 = vector.load %arg9[%c0_29, %c0_30] : memref<16x512xf32, #tpu.memory_space<vmem>>, vector<16x512xf32>
      %cst_31 = arith.constant dense<0.000000e+00> : vector<16x512xf32>
      %49 = tpu.matmul %44, %1, %cst_31 {dimension_numbers = #tpu.dot_dimension_numbers<[1], [0], [0], [1], [0, 0, 1, 1], [], []>} : vector<16x128xf32>, vector<128x512xf32>, vector<16x512xf32> -> vector<16x512xf32>
      %50 = arith.addf %48, %49 : vector<16x512xf32>
      %c0_32 = arith.constant 0 : index
      %c0_33 = arith.constant 0 : index
      %51 = vector.load %arg9[%c0_32, %c0_33] : memref<16x512xf32, #tpu.memory_space<vmem>>, vector<16x512xf32>
      tpu.vector_store %arg9[%c0_32, %c0_33], %50 {strides = array<i32>} : memref<16x512xf32, #tpu.memory_space<vmem>>, vector<16x512xf32>,
    } else {
    }
    %c2_i32 = arith.constant 2 : i32
    %8 = arith.cmpi sge, %arg0, %c2_i32 : i32
    %c2_i32_4 = arith.constant 2 : i32
    %c0_i32_5 = arith.constant 0 : i32
    %9 = arith.cmpi eq, %c2_i32_4, %c0_i32_5 : i32
    %c1_i32_6 = arith.constant 1 : i32
    %10 = arith.select %9, %c1_i32_6, %c2_i32_4 : i32
    %11 = arith.remsi %arg0, %10 : i32
    %c0_i32_7 = arith.constant 0 : i32
    %12 = arith.cmpi ne, %11, %c0_i32_7 : i32
    %c0_i32_8 = arith.constant 0 : i32
    %13 = arith.cmpi slt, %11, %c0_i32_8 : i32
    %c0_i32_9 = arith.constant 0 : i32
    %14 = arith.cmpi slt, %10, %c0_i32_9 : i32
    %15 = arith.xori %13, %14 : i1
    %16 = arith.andi %15, %12 : i1
    %17 = arith.addi %11, %10 : i32
    %18 = arith.select %16, %17, %11 : i32
    %c0_i32_10 = arith.constant 0 : i32
    %19 = arith.cmpi eq, %18, %c0_i32_10 : i32
    %20 = arith.andi %8, %19 : i1
    %21 = arith.extui %20 : i1 to i32
    %c0_i32_11 = arith.constant 0 : i32
    %22 = arith.cmpi ne, %21, %c0_i32_11 : i32
    scf.if %22 {
      %c0_22 = arith.constant 0 : index
      %c0_23 = arith.constant 0 : index
      %41 = vector.load %arg1[%c0_22, %c0_23] : memref<16x16xf32, #tpu.memory_space<vmem>>, vector<16x16xf32>
      %c1 = arith.constant 1 : index
      %c0_24 = arith.constant 0 : index
      %c0_25 = arith.constant 0 : index
      %42 = vector.load %arg8[%c1, %c0_24, %c0_25] : memref<2x16x128xf32, #tpu.memory_space<vmem>>, vector<1x16x128xf32>
      %43 = vector.shape_cast %42 : vector<1x16x128xf32> to vector<16x128xf32>
      %cst = arith.constant dense<0.000000e+00> : vector<16x128xf32>
      %44 = tpu.matmul %41, %43, %cst {dimension_numbers = #tpu.dot_dimension_numbers<[1], [0], [0], [1], [0, 0, 1, 1], [], []>} : vector<16x16xf32>, vector<16x128xf32>, vector<16x128xf32> -> vector<16x128xf32>
      %cst_26 = arith.constant 2.000000e+00 : f32
      %45 = vector.broadcast %cst_26 : f32 to vector<16x128xf32>
      %46 = arith.mulf %45, %44 : vector<16x128xf32>
      %c0_27 = arith.constant 0 : index
      %c0_28 = arith.constant 0 : index
      %c0_29 = arith.constant 0 : index
      %47 = vector.load %arg8[%c0_27, %c0_28, %c0_29] : memref<2x16x128xf32, #tpu.memory_space<vmem>>, vector<1x16x128xf32>
      %48 = vector.shape_cast %47 : vector<1x16x128xf32> to vector<16x128xf32>
      %49 = arith.subf %46, %48 : vector<16x128xf32>
      %c0_30 = arith.constant 0 : index
      %c0_31 = arith.constant 0 : index
      %c0_32 = arith.constant 0 : index
      %50 = vector.load %arg8[%c0_30, %c0_31, %c0_32] : memref<2x16x128xf32, #tpu.memory_space<vmem>>, vector<1x16x128xf32>
      %51 = vector.shape_cast %50 : vector<1x16x128xf32> to vector<16x128xf32>
      %52 = vector.shape_cast %49 : vector<16x128xf32> to vector<1x16x128xf32>
      tpu.vector_store %arg8[%c0_30, %c0_31, %c0_32], %52 {strides = array<i32>} : memref<2x16x128xf32, #tpu.memory_space<vmem>>, vector<1x16x128xf32>,
      %c0_33 = arith.constant 0 : index
      %c0_34 = arith.constant 0 : index
      %53 = vector.load %arg9[%c0_33, %c0_34] : memref<16x512xf32, #tpu.memory_space<vmem>>, vector<16x512xf32>
      %cst_35 = arith.constant dense<0.000000e+00> : vector<16x512xf32>
      %54 = tpu.matmul %49, %1, %cst_35 {dimension_numbers = #tpu.dot_dimension_numbers<[1], [0], [0], [1], [0, 0, 1, 1], [], []>} : vector<16x128xf32>, vector<128x512xf32>, vector<16x512xf32> -> vector<16x512xf32>
      %55 = arith.addf %53, %54 : vector<16x512xf32>
      %c0_36 = arith.constant 0 : index
      %c0_37 = arith.constant 0 : index
      %56 = vector.load %arg9[%c0_36, %c0_37] : memref<16x512xf32, #tpu.memory_space<vmem>>, vector<16x512xf32>
      tpu.vector_store %arg9[%c0_36, %c0_37], %55 {strides = array<i32>} : memref<16x512xf32, #tpu.memory_space<vmem>>, vector<16x512xf32>,
    } else {
    }
    %c2_i32_12 = arith.constant 2 : i32
    %23 = arith.cmpi sge, %arg0, %c2_i32_12 : i32
    %c2_i32_13 = arith.constant 2 : i32
    %c0_i32_14 = arith.constant 0 : i32
    %24 = arith.cmpi eq, %c2_i32_13, %c0_i32_14 : i32
    %c1_i32_15 = arith.constant 1 : i32
    %25 = arith.select %24, %c1_i32_15, %c2_i32_13 : i32
    %26 = arith.remsi %arg0, %25 : i32
    %c0_i32_16 = arith.constant 0 : i32
    %27 = arith.cmpi ne, %26, %c0_i32_16 : i32
    %c0_i32_17 = arith.constant 0 : i32
    %28 = arith.cmpi slt, %26, %c0_i32_17 : i32
    %c0_i32_18 = arith.constant 0 : i32
    %29 = arith.cmpi slt, %25, %c0_i32_18 : i32
    %30 = arith.xori %28, %29 : i1
    %31 = arith.andi %30, %27 : i1
    %32 = arith.addi %26, %25 : i32
    %33 = arith.select %31, %32, %26 : i32
    %c1_i32_19 = arith.constant 1 : i32
    %34 = arith.cmpi eq, %33, %c1_i32_19 : i32
    %35 = arith.andi %23, %34 : i1
    %36 = arith.extui %35 : i1 to i32
    %c0_i32_20 = arith.constant 0 : i32
    %37 = arith.cmpi ne, %36, %c0_i32_20 : i32
    scf.if %37 {
      %c0_22 = arith.constant 0 : index
      %c0_23 = arith.constant 0 : index
      %41 = vector.load %arg1[%c0_22, %c0_23] : memref<16x16xf32, #tpu.memory_space<vmem>>, vector<16x16xf32>
      %c0_24 = arith.constant 0 : index
      %c0_25 = arith.constant 0 : index
      %c0_26 = arith.constant 0 : index
      %42 = vector.load %arg8[%c0_24, %c0_25, %c0_26] : memref<2x16x128xf32, #tpu.memory_space<vmem>>, vector<1x16x128xf32>
      %43 = vector.shape_cast %42 : vector<1x16x128xf32> to vector<16x128xf32>
      %cst = arith.constant dense<0.000000e+00> : vector<16x128xf32>
      %44 = tpu.matmul %41, %43, %cst {dimension_numbers = #tpu.dot_dimension_numbers<[1], [0], [0], [1], [0, 0, 1, 1], [], []>} : vector<16x16xf32>, vector<16x128xf32>, vector<16x128xf32> -> vector<16x128xf32>
      %cst_27 = arith.constant 2.000000e+00 : f32
      %45 = vector.broadcast %cst_27 : f32 to vector<16x128xf32>
      %46 = arith.mulf %45, %44 : vector<16x128xf32>
      %c1 = arith.constant 1 : index
      %c0_28 = arith.constant 0 : index
      %c0_29 = arith.constant 0 : index
      %47 = vector.load %arg8[%c1, %c0_28, %c0_29] : memref<2x16x128xf32, #tpu.memory_space<vmem>>, vector<1x16x128xf32>
      %48 = vector.shape_cast %47 : vector<1x16x128xf32> to vector<16x128xf32>
      %49 = arith.subf %46, %48 : vector<16x128xf32>
      %c1_30 = arith.constant 1 : index
      %c0_31 = arith.constant 0 : index
      %c0_32 = arith.constant 0 : index
      %50 = vector.load %arg8[%c1_30, %c0_31, %c0_32] : memref<2x16x128xf32, #tpu.memory_space<vmem>>, vector<1x16x128xf32>
      %51 = vector.shape_cast %50 : vector<1x16x128xf32> to vector<16x128xf32>
      %52 = vector.shape_cast %49 : vector<16x128xf32> to vector<1x16x128xf32>
      tpu.vector_store %arg8[%c1_30, %c0_31, %c0_32], %52 {strides = array<i32>} : memref<2x16x128xf32, #tpu.memory_space<vmem>>, vector<1x16x128xf32>,
      %c0_33 = arith.constant 0 : index
      %c0_34 = arith.constant 0 : index
      %53 = vector.load %arg9[%c0_33, %c0_34] : memref<16x512xf32, #tpu.memory_space<vmem>>, vector<16x512xf32>
      %cst_35 = arith.constant dense<0.000000e+00> : vector<16x512xf32>
      %54 = tpu.matmul %49, %1, %cst_35 {dimension_numbers = #tpu.dot_dimension_numbers<[1], [0], [0], [1], [0, 0, 1, 1], [], []>} : vector<16x128xf32>, vector<128x512xf32>, vector<16x512xf32> -> vector<16x512xf32>
      %55 = arith.addf %53, %54 : vector<16x512xf32>
      %c0_36 = arith.constant 0 : index
      %c0_37 = arith.constant 0 : index
      %56 = vector.load %arg9[%c0_36, %c0_37] : memref<16x512xf32, #tpu.memory_space<vmem>>, vector<16x512xf32>
      tpu.vector_store %arg9[%c0_36, %c0_37], %55 {strides = array<i32>} : memref<16x512xf32, #tpu.memory_space<vmem>>, vector<16x512xf32>,
    } else {
    }
    %c3_i32 = arith.constant 3 : i32
    %38 = arith.cmpi eq, %arg0, %c3_i32 : i32
    %39 = arith.extui %38 : i1 to i32
    %c0_i32_21 = arith.constant 0 : i32
    %40 = arith.cmpi ne, %39, %c0_i32_21 : i32
    scf.if %40 {
      %c0_22 = arith.constant 0 : index
      %c0_23 = arith.constant 0 : index
      %41 = vector.load %arg9[%c0_22, %c0_23] : memref<16x512xf32, #tpu.memory_space<vmem>>, vector<16x512xf32>
      %42 = vector.extract_strided_slice %41 {offsets = [0, 0], sizes = [16, 128], strides = [1, 1]} : vector<16x512xf32> to vector<16x128xf32>
      %43 = arith.negf %42 : vector<16x128xf32>
      %44 = math.exp %43 : vector<16x128xf32>
      %cst = arith.constant 1.000000e+00 : f32
      %45 = vector.broadcast %cst : f32 to vector<16x128xf32>
      %46 = arith.addf %45, %44 : vector<16x128xf32>
      %47 = arith.divf %45, %46 : vector<16x128xf32>
      %48 = vector.extract_strided_slice %41 {offsets = [0, 128], sizes = [16, 128], strides = [1, 1]} : vector<16x512xf32> to vector<16x128xf32>
      %49 = arith.negf %48 : vector<16x128xf32>
      %50 = math.exp %49 : vector<16x128xf32>
      %cst_24 = arith.constant 1.000000e+00 : f32
      %51 = vector.broadcast %cst_24 : f32 to vector<16x128xf32>
      %52 = arith.addf %51, %50 : vector<16x128xf32>
      %53 = arith.divf %51, %52 : vector<16x128xf32>
      %54 = vector.extract_strided_slice %41 {offsets = [0, 256], sizes = [16, 128], strides = [1, 1]} : vector<16x512xf32> to vector<16x128xf32>
      %55 = arith.negf %54 : vector<16x128xf32>
      %56 = math.exp %55 : vector<16x128xf32>
      %cst_25 = arith.constant 1.000000e+00 : f32
      %57 = vector.broadcast %cst_25 : f32 to vector<16x128xf32>
      %58 = arith.addf %57, %56 : vector<16x128xf32>
      %59 = arith.divf %57, %58 : vector<16x128xf32>
      %60 = vector.extract_strided_slice %41 {offsets = [0, 384], sizes = [16, 128], strides = [1, 1]} : vector<16x512xf32> to vector<16x128xf32>
      %61 = math.tanh %60 : vector<16x128xf32>
      %62 = arith.mulf %53, %61 : vector<16x128xf32>
      %c0_26 = arith.constant 0 : index
      %c0_27 = arith.constant 0 : index
      %63 = vector.load %arg3[%c0_26, %c0_27] : memref<16x128xf32, #tpu.memory_space<vmem>>, vector<16x128xf32>
      %64 = arith.mulf %47, %63 : vector<16x128xf32>
      %65 = arith.addf %62, %64 : vector<16x128xf32>
      %c0_28 = arith.constant 0 : index
      %c0_29 = arith.constant 0 : index
      %66 = vector.load %arg7[%c0_28, %c0_29] : memref<16x128xf32, #tpu.memory_space<vmem>>, vector<16x128xf32>
      tpu.vector_store %arg7[%c0_28, %c0_29], %65 {strides = array<i32>} : memref<16x128xf32, #tpu.memory_space<vmem>>, vector<16x128xf32>,
      %67 = math.tanh %65 : vector<16x128xf32>
      %68 = arith.mulf %59, %67 : vector<16x128xf32>
      %c0_30 = arith.constant 0 : index
      %c0_31 = arith.constant 0 : index
      %69 = vector.load %arg6[%c0_30, %c0_31] : memref<16x128xf32, #tpu.memory_space<vmem>>, vector<16x128xf32>
      tpu.vector_store %arg6[%c0_30, %c0_31], %68 {strides = array<i32>} : memref<16x128xf32, #tpu.memory_space<vmem>>, vector<16x128xf32>,
    } else {
    }
    return
  }
  func.func @transform_0(%arg0: i32) -> (i32, i32) {
    %c0_i32 = arith.constant 0 : i32
    %c0_i32_0 = arith.constant 0 : i32
    %c0_i32_1 = arith.constant 0 : i32
    return %c0_i32, %c0_i32_0 : i32, i32
  }
  func.func @transform_1(%arg0: i32) -> (i32, i32) {
    %c0_i32 = arith.constant 0 : i32
    %c0_i32_0 = arith.constant 0 : i32
    %c0_i32_1 = arith.constant 0 : i32
    return %c0_i32, %c0_i32_0 : i32, i32
  }
  func.func @transform_2(%arg0: i32) -> (i32, i32) {
    %c0_i32 = arith.constant 0 : i32
    %c0_i32_0 = arith.constant 0 : i32
    %c0_i32_1 = arith.constant 0 : i32
    return %c0_i32, %c0_i32_0 : i32, i32
  }
  func.func @transform_3(%arg0: i32) -> (i32, i32) {
    %c0_i32 = arith.constant 0 : i32
    %c0_i32_0 = arith.constant 0 : i32
    %c0_i32_1 = arith.constant 0 : i32
    return %c0_i32, %c0_i32_0 : i32, i32
  }
  func.func @transform_4(%arg0: i32) -> (i32, i32, i32) {
    %c0_i32 = arith.constant 0 : i32
    %c0_i32_0 = arith.constant 0 : i32
    %c0_i32_1 = arith.constant 0 : i32
    return %arg0, %c0_i32, %c0_i32_0 : i32, i32, i32
  }
  func.func @transform_5(%arg0: i32) -> (i32, i32) {
    %c0_i32 = arith.constant 0 : i32
    %c0_i32_0 = arith.constant 0 : i32
    %c0_i32_1 = arith.constant 0 : i32
    return %c0_i32, %c0_i32_0 : i32, i32
  }
  func.func @transform_6(%arg0: i32) -> (i32, i32) {
    %c0_i32 = arith.constant 0 : i32
    %c0_i32_0 = arith.constant 0 : i32
    %c0_i32_1 = arith.constant 0 : i32
    return %c0_i32, %c0_i32_0 : i32, i32
  }
}

</mosaic_0001>

<bundles_post_ra>
// kernel: gclstm_forward.1
= control target key start
LH: loop header
LB: loop body
LE: loop exit
PB: predicated region body
PF: predicated region fallthrough
CT: control target
= control target key end

     0   :  { %12 = vsyncpa [#allocation5], 0  ;;  %s2015_s0 = inlined_call_operand.vmem [shape: f32[16,16], index: 0, kind: input, shape index: {}]   ;;  %s2016_s1 = inlined_call_operand.vmem [shape: f32[16,128], index: 1, kind: input, shape index: {}]   ;;  %s2017_s2 = inlined_call_operand.vmem [shape: f32[16,128], index: 2, kind: input, shape index: {}]   ;;  %s2018_s3 = inlined_call_operand.vmem [shape: f32[16,512], index: 3, kind: input, shape index: {}]   ;;  %s2019_s4 = inlined_call_operand.vmem [shape: f32[4,128,512], index: 4, kind: input, shape index: {}]   ;;  %s2020_s5 = inlined_call_operand.hbm [shape: f32[16,128], index: 5, kind: output, shape index: {0}]   ;;  %s2021_s6 = inlined_call_operand.hbm [shape: f32[16,128], index: 6, kind: output, shape index: {1}]  }
   0x1   :  { %13 = vsyncpa [#allocation7], 0  ;;  %s1341_s21 = smov 0  }
   0x2 LB: > { %s1347_s22 = sadd.s32 4294967295, %s1300_s21   ;;  %p1146_p0 = scmp.ge.s32.totalorder %s1300_s21, 1  ;;  %s1300_s21 = sphi %s1341_s21, %s19_s21  }
   0x3   : > { %p207_p1 = scmp.lt.s32.totalorder %s1300_s21, 5 }
   0x5   : > { %p208_p2 = pnand %p1146_p0, %p207_p1 }
   0x7   : > { %211 = sbr.rel (%p208_p2) target bundleno = 1144 (0x478), region = 40 }
   0xc   : > { %p232_p3 = scmp.lt.s32.totalorder %s1347_s22, 3  ;;  %p1149_p4 = scmp.ne.s32.totalorder %s1347_s22, 0 }
   0xe   : > { %s233_s23 = scalar_select %p232_p3, %s1347_s22, 3 }
  0x10   : > { %s1173_s24 = sshll.u32 %s233_s23, 9 }
  0x11   : > { %s1356_s27 = scalar_lea.vmem %s2019_s4, %s1173_s24 }
  0x12   : > { %v1359_v0 = vld [vmem:[%s1356_s27] sm:$0xff]  ;;  %v1362_v1 = vld [vmem:[%s1356_s27 + $0x8] sm:$0xff]  ;;  %v1365_v2 = vld [vmem:[%s1356_s27 + $0x10] sm:$0xff] }
  0x13   : > { %2038 = vst [vmem:[#allocation10_spill] sm:$0xff] %v1359_v0  ;;  %v1368_v3 = vld [vmem:[%s1356_s27 + $0x18] sm:$0xff]  ;;  %v1371_v4 = vld [vmem:[%s1356_s27 + $0x20] sm:$0xff]  ;;  %v1374_v5 = vld [vmem:[%s1356_s27 + $0x28] sm:$0xff] }
  0x14   : > { %2039 = vst [vmem:[#allocation11_spill] sm:$0xff] %v1362_v1  ;;  %v1377_v6 = vld [vmem:[%s1356_s27 + $0x30] sm:$0xff]  ;;  %v1380_v7 = vld [vmem:[%s1356_s27 + $0x38] sm:$0xff]  ;;  %v1383_v8 = vld [vmem:[%s1356_s27 + $0x40] sm:$0xff] }
  0x15   : > { %2040 = vst [vmem:[#allocation12_spill] sm:$0xff] %v1365_v2  ;;  %v1386_v9 = vld [vmem:[%s1356_s27 + $0x48] sm:$0xff]  ;;  %v1389_v10 = vld [vmem:[%s1356_s27 + $0x50] sm:$0xff]  ;;  %v1392_v11 = vld [vmem:[%s1356_s27 + $0x58] sm:$0xff] }
  0x16   : > { %2041 = vst [vmem:[#allocation13_spill] sm:$0xff] %v1368_v3  ;;  %v1395_v12 = vld [vmem:[%s1356_s27 + $0x60] sm:$0xff]  ;;  %v1398_v13 = vld [vmem:[%s1356_s27 + $0x68] sm:$0xff]  ;;  %v1401_v14 = vld [vmem:[%s1356_s27 + $0x70] sm:$0xff] }
  0x17   : > { %2042 = vst [vmem:[#allocation14_spill] sm:$0xff] %v1371_v4  ;;  %v1404_v15 = vld [vmem:[%s1356_s27 + $0x78] sm:$0xff]  ;;  %v1407_v16 = vld [vmem:[%s1356_s27 + $0x80] sm:$0xff]  ;;  %v1410_v17 = vld [vmem:[%s1356_s27 + $0x88] sm:$0xff] }
  0x18   : > { %2043 = vst [vmem:[#allocation15_spill] sm:$0xff] %v1374_v5  ;;  %v1413_v18 = vld [vmem:[%s1356_s27 + $0x90] sm:$0xff]  ;;  %v1416_v19 = vld [vmem:[%s1356_s27 + $0x98] sm:$0xff]  ;;  %v1419_v20 = vld [vmem:[%s1356_s27 + $0xa0] sm:$0xff] }
  0x19   : > { %2044 = vst [vmem:[#allocation16_spill] sm:$0xff] %v1377_v6  ;;  %v1422_v21 = vld [vmem:[%s1356_s27 + $0xa8] sm:$0xff]  ;;  %v1425_v22 = vld [vmem:[%s1356_s27 + $0xb0] sm:$0xff]  ;;  %v1428_v23 = vld [vmem:[%s1356_s27 + $0xb8] sm:$0xff] }
  0x1a   : > { %2045 = vst [vmem:[#allocation17_spill] sm:$0xff] %v1380_v7  ;;  %v1431_v24 = vld [vmem:[%s1356_s27 + $0xc0] sm:$0xff]  ;;  %v1434_v25 = vld [vmem:[%s1356_s27 + $0xc8] sm:$0xff]  ;;  %v1437_v26 = vld [vmem:[%s1356_s27 + $0xd0] sm:$0xff] }
  0x1b   : > { %2046 = vst [vmem:[#allocation18_spill] sm:$0xff] %v1383_v8  ;;  %v1440_v27 = vld [vmem:[%s1356_s27 + $0xd8] sm:$0xff]  ;;  %v1443_v28 = vld [vmem:[%s1356_s27 + $0xe0] sm:$0xff]  ;;  %v1446_v29 = vld [vmem:[%s1356_s27 + $0xe8] sm:$0xff] }
  0x1c   : > { %2047 = vst [vmem:[#allocation19_spill] sm:$0xff] %v1386_v9  ;;  %v1449_v30 = vld [vmem:[%s1356_s27 + $0xf0] sm:$0xff]  ;;  %v1452_v31 = vld [vmem:[%s1356_s27 + $0xf8] sm:$0xff]  ;;  %v1455_v32 = vld [vmem:[%s1356_s27 + $0x100] sm:$0xff] }
  0x1d   : > { %2048 = vst [vmem:[#allocation20_spill] sm:$0xff] %v1389_v10  ;;  %v1458_v33 = vld [vmem:[%s1356_s27 + $0x108] sm:$0xff]  ;;  %v1461_v34 = vld [vmem:[%s1356_s27 + $0x110] sm:$0xff]  ;;  %v1464_v35 = vld [vmem:[%s1356_s27 + $0x118] sm:$0xff] }
  0x1e   : > { %2049 = vst [vmem:[#allocation21_spill] sm:$0xff] %v1392_v11  ;;  %v1467_v36 = vld [vmem:[%s1356_s27 + $0x120] sm:$0xff]  ;;  %v1470_v37 = vld [vmem:[%s1356_s27 + $0x128] sm:$0xff]  ;;  %v1473_v38 = vld [vmem:[%s1356_s27 + $0x130] sm:$0xff] }
  0x1f   : > { %2050 = vst [vmem:[#allocation22_spill] sm:$0xff] %v1395_v12  ;;  %v1476_v39 = vld [vmem:[%s1356_s27 + $0x138] sm:$0xff]  ;;  %v1479_v40 = vld [vmem:[%s1356_s27 + $0x140] sm:$0xff]  ;;  %v1482_v41 = vld [vmem:[%s1356_s27 + $0x148] sm:$0xff] }
  0x20   : > { %2051 = vst [vmem:[#allocation23_spill] sm:$0xff] %v1398_v13  ;;  %v1485_v42 = vld [vmem:[%s1356_s27 + $0x150] sm:$0xff]  ;;  %v1488_v43 = vld [vmem:[%s1356_s27 + $0x158] sm:$0xff]  ;;  %v1491_v44 = vld [vmem:[%s1356_s27 + $0x160] sm:$0xff] }
  0x21   : > { %2052 = vst [vmem:[#allocation24_spill] sm:$0xff] %v1401_v14  ;;  %v1494_v45 = vld [vmem:[%s1356_s27 + $0x168] sm:$0xff]  ;;  %v1497_v46 = vld [vmem:[%s1356_s27 + $0x170] sm:$0xff]  ;;  %v1500_v47 = vld [vmem:[%s1356_s27 + $0x178] sm:$0xff] }
  0x22   : > { %2053 = vst [vmem:[#allocation25_spill] sm:$0xff] %v1404_v15  ;;  %v1503_v48 = vld [vmem:[%s1356_s27 + $0x180] sm:$0xff]  ;;  %v1506_v49 = vld [vmem:[%s1356_s27 + $0x188] sm:$0xff]  ;;  %v1509_v50 = vld [vmem:[%s1356_s27 + $0x190] sm:$0xff] }
  0x23   : > { %2054 = vst [vmem:[#allocation26_spill] sm:$0xff] %v1416_v19  ;;  %v1512_v51 = vld [vmem:[%s1356_s27 + $0x198] sm:$0xff]  ;;  %v1515_v52 = vld [vmem:[%s1356_s27 + $0x1a0] sm:$0xff]  ;;  %v1518_v53 = vld [vmem:[%s1356_s27 + $0x1a8] sm:$0xff]  ;;  %304 = sbr.rel (%p1149_p4) target bundleno = 215 (0xd7), region = 44 }
  0x24   : > { %2055 = vst [vmem:[#allocation27_spill] sm:$0xff] %v1428_v23  ;;  %v1521_v54 = vld [vmem:[%s1356_s27 + $0x1b0] sm:$0xff]  ;;  %v1524_v55 = vld [vmem:[%s1356_s27 + $0x1b8] sm:$0xff]  ;;  %v1527_v56 = vld [vmem:[%s1356_s27 + $0x1c0] sm:$0xff] }
  0x25   : > { %v1530_v57 = vld [vmem:[%s1356_s27 + $0x1c8] sm:$0xff]  ;;  %v1533_v58 = vld [vmem:[%s1356_s27 + $0x1d0] sm:$0xff]  ;;  %v1536_v59 = vld [vmem:[%s1356_s27 + $0x1d8] sm:$0xff] }
  0x26   : > { %v1539_v60 = vld [vmem:[%s1356_s27 + $0x1e0] sm:$0xff]  ;;  %v1542_v61 = vld [vmem:[%s1356_s27 + $0x1e8] sm:$0xff]  ;;  %v1545_v62 = vld [vmem:[%s1356_s27 + $0x1f0] sm:$0xff] }
  0x27   : > { %v1548_v63 = vld [vmem:[%s1356_s27 + $0x1f8] sm:$0xff] }
  0x28   : > { %363 = vmatpush.msra.mxu2 %v1545_v62  ;;  %386 = vmatpush.msra.mxu3 %v1548_v63  ;;  %v1556_v1 = vld [vmem:[%s2016_s1] sm:$0xff]  ;;  %v1564_v0 = vld [vmem:[%s2016_s1 + $0x8] sm:$0xff] }
  0x29   : > { %317 = vmatpush.msra.mxu0 %v1539_v60  ;;  %340 = vmatpush.msra.mxu1 %v1542_v61  ;;  %307 = vst [vmem:[#allocation2 + $0x10] sm:$0xff] %v1556_v1 }
  0x2a   : > { %364 = vmatpush.msra.mxu2 %v1533_v58  ;;  %387 = vmatpush.msra.mxu3 %v1536_v59  ;;  %308 = vst [vmem:[#allocation2] sm:$0xff] %v1564_v0 }
  0x2b   : > { %318 = vmatpush.msra.mxu0 %v1527_v56  ;;  %341 = vmatpush.msra.mxu1 %v1530_v57 }
  0x2c   : > { %365 = vmatpush.msra.mxu2 %v1521_v54  ;;  %388 = vmatpush.msra.mxu3 %v1524_v55 }
  0x2d   : > { %319 = vmatpush.msra.mxu0 %v1515_v52  ;;  %342 = vmatpush.msra.mxu1 %v1518_v53 }
  0x2e   : > { %366 = vmatpush.msra.mxu2 %v1509_v50  ;;  %389 = vmatpush.msra.mxu3 %v1512_v51 }
  0x2f   : > { %320 = vmatpush.msra.mxu0 %v1503_v48  ;;  %343 = vmatpush.msra.mxu1 %v1506_v49 }
  0x30   : > { %367 = vmatpush.msra.mxu2 %v1497_v46  ;;  %390 = vmatpush.msra.mxu3 %v1500_v47 }
  0x31   : > { %321 = vmatpush.msra.mxu0 %v1491_v44  ;;  %344 = vmatpush.msra.mxu1 %v1494_v45 }
  0x32   : > { %368 = vmatpush.msra.mxu2 %v1485_v42  ;;  %391 = vmatpush.msra.mxu3 %v1488_v43 }
  0x33   : > { %322 = vmatpush.msra.mxu0 %v1479_v40  ;;  %345 = vmatpush.msra.mxu1 %v1482_v41 }
  0x34   : > { %369 = vmatpush.msra.mxu2 %v1473_v38  ;;  %392 = vmatpush.msra.mxu3 %v1476_v39 }
  0x35   : > { %323 = vmatpush.msra.mxu0 %v1467_v36  ;;  %346 = vmatpush.msra.mxu1 %v1470_v37 }
  0x36   : > { %370 = vmatpush.msra.mxu2 %v1461_v34  ;;  %393 = vmatpush.msra.mxu3 %v1464_v35 }
  0x37   : > { %324 = vmatpush.msra.mxu0 %v1455_v32  ;;  %347 = vmatpush.msra.mxu1 %v1458_v33 }
  0x38   : > { %371 = vmatpush.msra.mxu2 %v1449_v30  ;;  %394 = vmatpush.msra.mxu3 %v1452_v31 }
  0x39   : > { %325 = vmatpush.msra.mxu0 %v1443_v28  ;;  %348 = vmatpush.msra.mxu1 %v1446_v29 }
  0x3a   : > { %372 = vmatpush.msra.mxu2 %v1437_v26  ;;  %395 = vmatpush.msra.mxu3 %v1440_v27 }
  0x3b   : > { %326 = vmatpush.msra.mxu0 %v1431_v24  ;;  %349 = vmatpush.msra.mxu1 %v1434_v25 }
  0x3c   : > { %373 = vmatpush.msra.mxu2 %v1425_v22  ;;  %396 = vmatpush.msra.mxu3 %v1428_v23 }
  0x3d   : > { %327 = vmatpush.msra.mxu0 %v1419_v20  ;;  %350 = vmatpush.msra.mxu1 %v1422_v21 }
  0x3e   : > { %374 = vmatpush.msra.mxu2 %v1413_v18  ;;  %397 = vmatpush.msra.mxu3 %v1416_v19 }
  0x3f   : > { %328 = vmatpush.msra.mxu0 %v1407_v16  ;;  %351 = vmatpush.msra.mxu1 %v1410_v17 }
  0x40   : > { %375 = vmatpush.msra.mxu2 %v1401_v14  ;;  %398 = vmatpush.msra.mxu3 %v1404_v15  ;;  %v2057_v15 = vld [vmem:[#allocation11_spill] sm:$0xff] }
  0x41   : > { %329 = vmatpush.msra.mxu0 %v1395_v12  ;;  %352 = vmatpush.msra.mxu1 %v1398_v13 }
  0x42   : > { %376 = vmatpush.msra.mxu2 %v1389_v10  ;;  %399 = vmatpush.msra.mxu3 %v1392_v11  ;;  %v2056_v11 = vld [vmem:[#allocation10_spill] sm:$0xff] }
  0x43   : > { %330 = vmatpush.msra.mxu0 %v1383_v8  ;;  %353 = vmatpush.msra.mxu1 %v1386_v9  ;;  %v313_v8 = vld [vmem:[%s2018_s3 + $0x20] sm:$0xff] }
  0x44   : > { %377 = vmatpush.msra.mxu2 %v1377_v6  ;;  %400 = vmatpush.msra.mxu3 %v1380_v7  ;;  %v311_v6 = vld [vmem:[%s2018_s3 + $0x10] sm:$0xff] }
  0x45   : > { %331 = vmatpush.msra.mxu0 %v1371_v4  ;;  %354 = vmatpush.msra.mxu1 %v1374_v5 }
  0x46   : > { %378 = vmatpush.msra.mxu2 %v1365_v2  ;;  %401 = vmatpush.msra.mxu3 %v1368_v3  ;;  %v309_v3 = vld [vmem:[%s2018_s3] sm:$0xff] }
  0x47   : > { %379 = vmatmul.f32.vlgmr.msra.gmra.mxu2 %v1556_v1  ;;  %402 = vmatmul.f32.vlgmr.msra.gmra.mxu3 %v1556_v1 }
  0x48   : > { %332 = vmatpush.msra.mxu0 %v2056_v11  ;;  %355 = vmatpush.msra.mxu1 %v2057_v15  ;;  %v310_v11 = vld [vmem:[%s2018_s3 + $0x8] sm:$0xff] }
  0x49   : > { %333 = vmatmul.f32.vlgmr.msra.gmra.mxu0 %v1556_v1  ;;  %356 = vmatmul.f32.vlgmr.msra.gmra.mxu1 %v1556_v1 }
  0x4f   : > { %382 = vmatmul.f32.gmra.mxu2 %v1564_v0  ;;  %405 = vmatmul.f32.gmra.mxu3 %v1564_v0 }
  0x51   : > { %336 = vmatmul.f32.gmra.mxu0 %v1564_v0  ;;  %359 = vmatmul.f32.gmra.mxu1 %v1564_v0  ;;  %v312_v0 = vld [vmem:[%s2018_s3 + $0x18] sm:$0xff] }
  0xc6   : > { %v334_v15 = vpop.f32.mrf.mxu0  ;;  %v357_v7 = vpop.f32.mrf.mxu1 }
  0xc7   : > { %v409_v2 = vadd.f32 %v334_v15, %v309_v3  ;;  %v410_v1 = vadd.f32 %v357_v7, %v310_v11  ;;  %v314_v3 = vld [vmem:[%s2018_s3 + $0x28] sm:$0xff] }
  0xc9   : > { %417 = vst [vmem:[#allocation3] sm:$0xff] %v409_v2  ;;  %v315_v2 = vld [vmem:[%s2018_s3 + $0x30] sm:$0xff] }
  0xca   : > { %418 = vst [vmem:[#allocation3 + $0x38] sm:$0xff] %v410_v1  ;;  %v380_v5 = vpop.f32.mrf.mxu2  ;;  %v403_v4 = vpop.f32.mrf.mxu3 }
  0xcb   : > { %v411_v10 = vadd.f32 %v380_v5, %v311_v6  ;;  %v412_v9 = vadd.f32 %v403_v4, %v312_v0  ;;  %v316_v4 = vld [vmem:[%s2018_s3 + $0x38] sm:$0xff] }
  0xcd   : > { %419 = vst [vmem:[#allocation3 + $0x8] sm:$0xff] %v411_v10 }
  0xce   : > { %420 = vst [vmem:[#allocation3 + $0x18] sm:$0xff] %v412_v9  ;;  %v337_v7 = vpop.f32.mrf.mxu0  ;;  %v360_v11 = vpop.f32.mrf.mxu1 }
  0xcf   : > { %v413_v15 = vadd.f32 %v337_v7, %v313_v8  ;;  %v414_v19 = vadd.f32 %v360_v11, %v314_v3 }
  0xd1   : > { %421 = vst [vmem:[#allocation3 + $0x20] sm:$0xff] %v413_v15 }
  0xd2   : > { %422 = vst [vmem:[#allocation3 + $0x10] sm:$0xff] %v414_v19  ;;  %v383_v5 = vpop.f32.mrf.mxu2  ;;  %v406_v6 = vpop.f32.mrf.mxu3 }
  0xd3   : > { %v415_v1 = vadd.f32 %v383_v5, %v315_v2  ;;  %v416_v0 = vadd.f32 %v406_v6, %v316_v4 }
  0xd5   : > { %423 = vst [vmem:[#allocation3 + $0x30] sm:$0xff] %v415_v1 }
  0xd6   : > { %424 = vst [vmem:[#allocation3 + $0x28] sm:$0xff] %v416_v0 }
  0xd7 PF: > { %p1150_p5 = scmp.ne.s32.totalorder %s1347_s22, 1 }
  0xd9   : > { %428 = sbr.rel (%p1150_p5) target bundleno = 496 (0x1f0), region = 48 }
  0xde   : > { %v432_v8 = vld [vmem:[#allocation2] sm:$0xff]  ;;  %v431_v9 = vld [vmem:[#allocation2 + $0x10] sm:$0xff]  ;;  %474 = vmatpush.msra.mxu1 %v1539_v60  ;;  %497 = vmatpush.msra.mxu2 %v1542_v61  ;;  %vm433_vm0 = vcmask 130048   ;;  %v430_v19 = vld [vmem:[%s2015_s0 + $0x8] sm:$0xff] }
  0xdf   : > { %454 = vmatpush.msra.mxu0 %v432_v8  ;;  %v429_v10 = vld [vmem:[%s2015_s0] sm:$0xff]  ;;  %520 = vmatpush.msra.mxu3 %v1545_v62  ;;  %v2060_v11 = vld [vmem:[#allocation19_spill] sm:$0xff]  ;;  %v2061_v15 = vld [vmem:[#allocation20_spill] sm:$0xff] }
  0xe0   : > { %475 = vmatpush.msra.mxu1 %v1527_v56  ;;  %498 = vmatpush.msra.mxu2 %v1530_v57  ;;  %v2058_v3 = vld [vmem:[#allocation26_spill] sm:$0xff]  ;;  %v2062_v2 = vld [vmem:[#allocation25_spill] sm:$0xff]  ;;  %v2064_v5 = vld [vmem:[#allocation15_spill] sm:$0xff] }
  0xe1   : > { %455 = vmatpush.msra.mxu0 %v431_v9  ;;  %521 = vmatpush.msra.mxu3 %v1533_v58  ;;  %v2059_v7 = vld [vmem:[#allocation18_spill] sm:$0xff]  ;;  %v2065_v6 = vld [vmem:[#allocation16_spill] sm:$0xff]  ;;  %v2066_v1 = vld [vmem:[#allocation21_spill] sm:$0xff] }
  0xe2   : > { %1151 = vmatmul.msk.f32.vlgmr.msra.gmra.mxu0 %vm433_vm0, %v429_v10  ;;  %476 = vmatpush.msra.mxu1 %v1515_v52  ;;  %v2063_v4 = vld [vmem:[#allocation14_spill] sm:$0xff]  ;;  %v2068_v8 = vld [vmem:[#allocation11_spill] sm:$0xff]  ;;  %v2069_v9 = vld [vmem:[#allocation12_spill] sm:$0xff] }
  0xe3   : > { %543 = vmatpush.msrb.mxu0 %v1548_v63  ;;  %499 = vmatpush.msra.mxu2 %v1518_v53  ;;  %v2067_v0 = vld [vmem:[#allocation10_spill] sm:$0xff]  ;;  %v2070_v10 = vld [vmem:[#allocation17_spill] sm:$0xff] }
  0xe4   : > { %522 = vmatpush.msra.mxu3 %v1521_v54  ;;  %477 = vmatpush.msra.mxu1 %v1503_v48 }
  0xe5   : > { %544 = vmatpush.msrb.mxu0 %v1536_v59  ;;  %500 = vmatpush.msra.mxu2 %v1506_v49 }
  0xe6   : > { %523 = vmatpush.msra.mxu3 %v1509_v50  ;;  %478 = vmatpush.msra.mxu1 %v1491_v44 }
  0xe7   : > { %545 = vmatpush.msrb.mxu0 %v1524_v55  ;;  %501 = vmatpush.msra.mxu2 %v1494_v45 }
  0xe8   : > { %524 = vmatpush.msra.mxu3 %v1497_v46  ;;  %479 = vmatpush.msra.mxu1 %v1479_v40 }
  0xe9   : > { %546 = vmatpush.msrb.mxu0 %v1512_v51  ;;  %502 = vmatpush.msra.mxu2 %v1482_v41 }
  0xea   : > { %1152 = vmatmul.msk.f32.gmra.mxu0 %vm433_vm0, %v430_v19  ;;  %525 = vmatpush.msra.mxu3 %v1485_v42  ;;  %v2071_v19 = vld [vmem:[#allocation13_spill] sm:$0xff] }
  0xeb   : > { %547 = vmatpush.msrb.mxu0 %v1500_v47  ;;  %480 = vmatpush.msra.mxu1 %v1467_v36 }
  0xec   : > { %503 = vmatpush.msra.mxu2 %v1470_v37  ;;  %526 = vmatpush.msra.mxu3 %v1473_v38 }
  0xed   : > { %548 = vmatpush.msrb.mxu0 %v1488_v43  ;;  %481 = vmatpush.msra.mxu1 %v1455_v32 }
  0xee   : > { %504 = vmatpush.msra.mxu2 %v1458_v33  ;;  %527 = vmatpush.msra.mxu3 %v1461_v34 }
  0xef   : > { %549 = vmatpush.msrb.mxu0 %v1476_v39  ;;  %482 = vmatpush.msra.mxu1 %v1443_v28 }
  0xf0   : > { %505 = vmatpush.msra.mxu2 %v1446_v29  ;;  %528 = vmatpush.msra.mxu3 %v1449_v30 }
  0xf1   : > { %550 = vmatpush.msrb.mxu0 %v1464_v35  ;;  %483 = vmatpush.msra.mxu1 %v1431_v24 }
  0xf2   : > { %506 = vmatpush.msra.mxu2 %v1434_v25  ;;  %529 = vmatpush.msra.mxu3 %v1437_v26 }
  0xf3   : > { %551 = vmatpush.msrb.mxu0 %v1452_v31  ;;  %484 = vmatpush.msra.mxu1 %v1419_v20 }
  0xf4   : > { %507 = vmatpush.msra.mxu2 %v1422_v21  ;;  %530 = vmatpush.msra.mxu3 %v1425_v22 }
  0xf5   : > { %552 = vmatpush.msrb.mxu0 %v1440_v27  ;;  %485 = vmatpush.msra.mxu1 %v1407_v16 }
  0xf6   : > { %508 = vmatpush.msra.mxu2 %v1410_v17  ;;  %531 = vmatpush.msra.mxu3 %v1413_v18 }
  0xf7   : > { %553 = vmatpush.msrb.mxu0 %v1428_v23  ;;  %486 = vmatpush.msra.mxu1 %v1395_v12 }
  0xf8   : > { %509 = vmatpush.msra.mxu2 %v1398_v13  ;;  %532 = vmatpush.msra.mxu3 %v1401_v14 }
  0xf9   : > { %554 = vmatpush.msrb.mxu0 %v2058_v3  ;;  %487 = vmatpush.msra.mxu1 %v2059_v7 }
  0xfa   : > { %510 = vmatpush.msra.mxu2 %v2060_v11  ;;  %533 = vmatpush.msra.mxu3 %v2061_v15  ;;  %v466_v11 = vld [vmem:[#allocation3] sm:$0xff]  ;;  %v469_v15 = vld [vmem:[#allocation3 + $0x18] sm:$0xff] }
  0xfb   : > { %555 = vmatpush.msrb.mxu0 %v2062_v2  ;;  %488 = vmatpush.msra.mxu1 %v2063_v4 }
  0xfc   : > { %511 = vmatpush.msra.mxu2 %v2064_v5  ;;  %534 = vmatpush.msra.mxu3 %v2065_v6 }
  0xfd   : > { %556 = vmatpush.msrb.mxu0 %v2066_v1  ;;  %489 = vmatpush.msra.mxu1 %v2067_v0  ;;  %v467_v1 = vld [vmem:[#allocation3 + $0x38] sm:$0xff]  ;;  %v468_v0 = vld [vmem:[#allocation3 + $0x8] sm:$0xff] }
  0xfe   : > { %512 = vmatpush.msra.mxu2 %v2068_v8  ;;  %535 = vmatpush.msra.mxu3 %v2069_v9  ;;  %v470_v9 = vld [vmem:[#allocation3 + $0x20] sm:$0xff] }
  0xff   : > { %557 = vmatpush.msrb.mxu0 %v2070_v10 }
 0x101   : > { %558 = vmatpush.msrb.mxu0 %v2071_v19 }
 0x15f   : > { %v457_v3 = vpop.f32.mrf.mxu0 }
 0x160   : > { %464 = vst [vmem:[#allocation2 + $0x18] sm:$0xff] %v457_v3  ;;  %490 = vmatmul.f32.vlgmr.msra.gmra.mxu1 %v457_v3  ;;  %513 = vmatmul.f32.vlgmr.msra.gmra.mxu2 %v457_v3 }
 0x161   : > { %536 = vmatmul.f32.vlgmr.msra.gmra.mxu3 %v457_v3  ;;  %559 = vmatmul.f32.vlgmr.msrb.gmra.mxu0 %v457_v3  ;;  %v473_v3 = vld [vmem:[#allocation3 + $0x28] sm:$0xff] }
 0x167   : > { %v460_v7 = vpop.f32.mrf.mxu0 }
 0x168   : > { %465 = vst [vmem:[#allocation2 + $0x8] sm:$0xff] %v460_v7  ;;  %493 = vmatmul.f32.gmra.mxu1 %v460_v7  ;;  %516 = vmatmul.f32.gmra.mxu2 %v460_v7 }
 0x169   : > { %539 = vmatmul.f32.gmra.mxu3 %v460_v7  ;;  %562 = vmatmul.f32.gmra.mxu0 %v460_v7 }
 0x1dd   : > { %v491_v2 = vpop.f32.mrf.mxu1 }
 0x1de   : > { %v566_v4 = vadd.f32 %v491_v2, %v466_v11  ;;  %v560_v5 = vpop.f32.mrf.mxu0  ;;  %v471_v11 = vld [vmem:[#allocation3 + $0x10] sm:$0xff] }
 0x1df   : > { %v569_v6 = vadd.f32 %v560_v5, %v469_v15  ;;  %v472_v15 = vld [vmem:[#allocation3 + $0x30] sm:$0xff] }
 0x1e0   : > { %574 = vst [vmem:[#allocation3] sm:$0xff] %v566_v4 }
 0x1e1   : > { %577 = vst [vmem:[#allocation3 + $0x18] sm:$0xff] %v569_v6 }
 0x1e3   : > { %v514_v8 = vpop.f32.mrf.mxu2 }
 0x1e4   : > { %v567_v10 = vadd.f32 %v514_v8, %v467_v1  ;;  %v537_v19 = vpop.f32.mrf.mxu3 }
 0x1e5   : > { %v568_v14 = vadd.f32 %v537_v19, %v468_v0  ;;  %v494_v13 = vpop.f32.mrf.mxu1 }
 0x1e6   : > { %575 = vst [vmem:[#allocation3 + $0x38] sm:$0xff] %v567_v10  ;;  %v570_v12 = vadd.f32 %v494_v13, %v470_v9  ;;  %v563_v7 = vpop.f32.mrf.mxu0 }
 0x1e7   : > { %576 = vst [vmem:[#allocation3 + $0x8] sm:$0xff] %v568_v14  ;;  %v573_v23 = vadd.f32 %v563_v7, %v473_v3 }
 0x1e8   : > { %578 = vst [vmem:[#allocation3 + $0x20] sm:$0xff] %v570_v12 }
 0x1e9   : > { %581 = vst [vmem:[#allocation3 + $0x28] sm:$0xff] %v573_v23 }
 0x1eb   : > { %v517_v2 = vpop.f32.mrf.mxu2 }
 0x1ec   : > { %v571_v4 = vadd.f32 %v517_v2, %v471_v11  ;;  %v540_v5 = vpop.f32.mrf.mxu3 }
 0x1ed   : > { %v572_v6 = vadd.f32 %v540_v5, %v472_v15 }
 0x1ee   : > { %579 = vst [vmem:[#allocation3 + $0x10] sm:$0xff] %v571_v4 }
 0x1ef   : > { %580 = vst [vmem:[#allocation3 + $0x30] sm:$0xff] %v572_v6 }
 0x1f0 PF: > { %p583_p6 = scmp.lt.s32.totalorder %s1347_s22, 0  ;;  %s584_s30 = ssub.s32 0, %s1347_s22 }
 0x1f1   : > { %s1153_s7 = smin.u32 %s1347_s22, %s584_s30  ;;  %p582_p8 = scmp.ge.s32.totalorder %s1347_s22, 2 }
 0x1f2   : > { %s586_s8 = sand.u32 1, %s1153_s7  }
 0x1f3   : > { %s587_s9 = ssub.s32 0, %s586_s8 }
 0x1f4   : > { %s2125_s9 = smov (!%p583_p6, %s587_s9), %s586_s8 }
 0x1f5   : > { %p1155_p7 = scmp.lt.s32.totalorder %s2125_s9, 0  ;;  %s593_s10 = sadd.s32 2, %s2125_s9 }
 0x1f7   : > { %s2127_s10 = smov (!%p1155_p7, %s593_s10), %s2125_s9 }
 0x1f8   : > { %p595_p9 = scmp.eq.s32.totalorder %s2127_s10, 0 }
 0x1fa   : > { %p596_p10 = pnand %p595_p9, %p582_p8 }
 0x1fc   : > { %599 = sbr.rel (%p596_p10) target bundleno = 791 (0x317), region = 52 }
 0x201   : > { %v604_v12 = vld [vmem:[#allocation2 + $0x8] sm:$0xff]  ;;  %v603_v13 = vld [vmem:[#allocation2 + $0x18] sm:$0xff]  ;;  %651 = vmatpush.msra.mxu1 %v1539_v60  ;;  %674 = vmatpush.msra.mxu2 %v1542_v61  ;;  %v600_v14 = vld [vmem:[%s2015_s0] sm:$0xff]  ;;  %vm605_vm1 = vcmask 130048  }
 0x202   : > { %626 = vmatpush.msra.mxu0 %v604_v12  ;;  %697 = vmatpush.msra.mxu3 %v1545_v62  ;;  %v601_v23 = vld [vmem:[%s2015_s0 + $0x8] sm:$0xff]  ;;  %v2073_v0 = vld [vmem:[#allocation22_spill] sm:$0xff]  ;;  %v2075_v9 = vld [vmem:[#allocation24_spill] sm:$0xff] }
 0x203   : > { %652 = vmatpush.msra.mxu1 %v1527_v56  ;;  %675 = vmatpush.msra.mxu2 %v1530_v57  ;;  %v2072_v1 = vld [vmem:[#allocation27_spill] sm:$0xff]  ;;  %v2076_v10 = vld [vmem:[#allocation26_spill] sm:$0xff]  ;;  %v2079_v7 = vld [vmem:[#allocation20_spill] sm:$0xff] }
 0x204   : > { %627 = vmatpush.msra.mxu0 %v603_v13  ;;  %698 = vmatpush.msra.mxu3 %v1533_v58  ;;  %v2074_v8 = vld [vmem:[#allocation23_spill] sm:$0xff]  ;;  %v2077_v19 = vld [vmem:[#allocation18_spill] sm:$0xff]  ;;  %v2080_v11 = vld [vmem:[#allocation25_spill] sm:$0xff] }
 0x205   : > { %1156 = vmatmul.msk.f32.vlgmr.msra.gmra.mxu0 %vm605_vm1, %v600_v14  ;;  %653 = vmatpush.msra.mxu1 %v1515_v52  ;;  %v2078_v3 = vld [vmem:[#allocation19_spill] sm:$0xff]  ;;  %v2081_v15 = vld [vmem:[#allocation14_spill] sm:$0xff]  ;;  %v2083_v4 = vld [vmem:[#allocation16_spill] sm:$0xff] }
 0x206   : > { %720 = vmatpush.msrb.mxu0 %v1548_v63  ;;  %676 = vmatpush.msra.mxu2 %v1518_v53  ;;  %v2082_v2 = vld [vmem:[#allocation15_spill] sm:$0xff]  ;;  %v2084_v5 = vld [vmem:[#allocation21_spill] sm:$0xff]  ;;  %v2085_v6 = vld [vmem:[#allocation10_spill] sm:$0xff] }
 0x207   : > { %699 = vmatpush.msra.mxu3 %v1521_v54  ;;  %654 = vmatpush.msra.mxu1 %v1503_v48  ;;  %v2086_v12 = vld [vmem:[#allocation11_spill] sm:$0xff]  ;;  %v2087_v13 = vld [vmem:[#allocation12_spill] sm:$0xff]  ;;  %v2088_v14 = vld [vmem:[#allocation17_spill] sm:$0xff] }
 0x208   : > { %721 = vmatpush.msrb.mxu0 %v1536_v59  ;;  %677 = vmatpush.msra.mxu2 %v1506_v49 }
 0x209   : > { %700 = vmatpush.msra.mxu3 %v1509_v50  ;;  %655 = vmatpush.msra.mxu1 %v1491_v44 }
 0x20a   : > { %722 = vmatpush.msrb.mxu0 %v1524_v55  ;;  %678 = vmatpush.msra.mxu2 %v1494_v45 }
 0x20b   : > { %701 = vmatpush.msra.mxu3 %v1497_v46  ;;  %656 = vmatpush.msra.mxu1 %v1479_v40 }
 0x20c   : > { %723 = vmatpush.msrb.mxu0 %v1512_v51  ;;  %679 = vmatpush.msra.mxu2 %v1482_v41 }
 0x20d   : > { %1157 = vmatmul.msk.f32.gmra.mxu0 %vm605_vm1, %v601_v23  ;;  %702 = vmatpush.msra.mxu3 %v1485_v42  ;;  %v2089_v23 = vld [vmem:[#allocation13_spill] sm:$0xff] }
 0x20e   : > { %724 = vmatpush.msrb.mxu0 %v1500_v47  ;;  %657 = vmatpush.msra.mxu1 %v1467_v36 }
 0x20f   : > { %680 = vmatpush.msra.mxu2 %v1470_v37  ;;  %703 = vmatpush.msra.mxu3 %v1473_v38 }
 0x210   : > { %725 = vmatpush.msrb.mxu0 %v1488_v43  ;;  %658 = vmatpush.msra.mxu1 %v1455_v32 }
 0x211   : > { %681 = vmatpush.msra.mxu2 %v1458_v33  ;;  %704 = vmatpush.msra.mxu3 %v1461_v34 }
 0x212   : > { %726 = vmatpush.msrb.mxu0 %v1476_v39  ;;  %659 = vmatpush.msra.mxu1 %v1443_v28 }
 0x213   : > { %682 = vmatpush.msra.mxu2 %v1446_v29  ;;  %705 = vmatpush.msra.mxu3 %v1449_v30 }
 0x214   : > { %727 = vmatpush.msrb.mxu0 %v1464_v35  ;;  %660 = vmatpush.msra.mxu1 %v1431_v24 }
 0x215   : > { %683 = vmatpush.msra.mxu2 %v1434_v25  ;;  %706 = vmatpush.msra.mxu3 %v1437_v26 }
 0x216   : > { %728 = vmatpush.msrb.mxu0 %v1452_v31  ;;  %661 = vmatpush.msra.mxu1 %v1419_v20 }
 0x217   : > { %684 = vmatpush.msra.mxu2 %v1422_v21  ;;  %707 = vmatpush.msra.mxu3 %v1425_v22 }
 0x218   : > { %729 = vmatpush.msrb.mxu0 %v1440_v27  ;;  %662 = vmatpush.msra.mxu1 %v1407_v16 }
 0x219   : > { %685 = vmatpush.msra.mxu2 %v1410_v17  ;;  %708 = vmatpush.msra.mxu3 %v1413_v18 }
 0x21a   : > { %730 = vmatpush.msrb.mxu0 %v2072_v1  ;;  %663 = vmatpush.msra.mxu1 %v2073_v0  ;;  %v637_v0 = vld [vmem:[#allocation2 + $0x10] sm:$0xff] }
 0x21b   : > { %686 = vmatpush.msra.mxu2 %v2074_v8  ;;  %709 = vmatpush.msra.mxu3 %v2075_v9 }
 0x21c   : > { %731 = vmatpush.msrb.mxu0 %v2076_v10  ;;  %664 = vmatpush.msra.mxu1 %v2077_v19  ;;  %v638_v19 = vld [vmem:[#allocation2] sm:$0xff] }
 0x21d   : > { %687 = vmatpush.msra.mxu2 %v2078_v3  ;;  %710 = vmatpush.msra.mxu3 %v2079_v7 }
 0x21e   : > { %732 = vmatpush.msrb.mxu0 %v2080_v11  ;;  %665 = vmatpush.msra.mxu1 %v2081_v15  ;;  %v643_v11 = vld [vmem:[#allocation3] sm:$0xff]  ;;  %v646_v15 = vld [vmem:[#allocation3 + $0x18] sm:$0xff] }
 0x21f   : > { %688 = vmatpush.msra.mxu2 %v2082_v2  ;;  %711 = vmatpush.msra.mxu3 %v2083_v4 }
 0x220   : > { %733 = vmatpush.msrb.mxu0 %v2084_v5  ;;  %666 = vmatpush.msra.mxu1 %v2085_v6 }
 0x221   : > { %689 = vmatpush.msra.mxu2 %v2086_v12  ;;  %712 = vmatpush.msra.mxu3 %v2087_v13  ;;  %v644_v12 = vld [vmem:[#allocation3 + $0x38] sm:$0xff]  ;;  %v645_v13 = vld [vmem:[#allocation3 + $0x8] sm:$0xff] }
 0x222   : > { %734 = vmatpush.msrb.mxu0 %v2088_v14 }
 0x224   : > { %735 = vmatpush.msrb.mxu0 %v2089_v23  ;;  %v647_v23 = vld [vmem:[#allocation3 + $0x20] sm:$0xff] }
 0x282   : > { %v629_v1 = vpop.f32.mrf.mxu0 }
 0x283   : > { %v635_v8 = vmul.f32 2.0, %v629_v1 }
 0x285   : > { %v639_v9 = vsub.f32 %v635_v8, %v637_v0  ;;  %v650_v8 = vld [vmem:[#allocation3 + $0x28] sm:$0xff] }
 0x287   : > { %641 = vst [vmem:[#allocation2 + $0x10] sm:$0xff] %v639_v9  ;;  %667 = vmatmul.f32.vlgmr.msra.gmra.mxu1 %v639_v9  ;;  %690 = vmatmul.f32.vlgmr.msra.gmra.mxu2 %v639_v9 }
 0x288   : > { %713 = vmatmul.f32.vlgmr.msra.gmra.mxu3 %v639_v9  ;;  %736 = vmatmul.f32.vlgmr.msrb.gmra.mxu0 %v639_v9 }
 0x28a   : > { %v632_v10 = vpop.f32.mrf.mxu0 }
 0x28b   : > { %v636_v3 = vmul.f32 2.0, %v632_v10 }
 0x28d   : > { %v640_v7 = vsub.f32 %v636_v3, %v638_v19 }
 0x28f   : > { %642 = vst [vmem:[#allocation2] sm:$0xff] %v640_v7  ;;  %670 = vmatmul.f32.gmra.mxu1 %v640_v7  ;;  %693 = vmatmul.f32.gmra.mxu2 %v640_v7 }
 0x290   : > { %716 = vmatmul.f32.gmra.mxu3 %v640_v7  ;;  %739 = vmatmul.f32.gmra.mxu0 %v640_v7 }
 0x304   : > { %v668_v2 = vpop.f32.mrf.mxu1 }
 0x305   : > { %v743_v4 = vadd.f32 %v668_v2, %v643_v11  ;;  %v737_v5 = vpop.f32.mrf.mxu0  ;;  %v648_v11 = vld [vmem:[#allocation3 + $0x10] sm:$0xff] }
 0x306   : > { %v746_v6 = vadd.f32 %v737_v5, %v646_v15  ;;  %v649_v15 = vld [vmem:[#allocation3 + $0x30] sm:$0xff] }
 0x307   : > { %751 = vst [vmem:[#allocation3] sm:$0xff] %v743_v4 }
 0x308   : > { %754 = vst [vmem:[#allocation3 + $0x18] sm:$0xff] %v746_v6 }
 0x30a   : > { %v691_v14 = vpop.f32.mrf.mxu2 }
 0x30b   : > { %v744_v1 = vadd.f32 %v691_v14, %v644_v12  ;;  %v714_v0 = vpop.f32.mrf.mxu3 }
 0x30c   : > { %v745_v9 = vadd.f32 %v714_v0, %v645_v13  ;;  %v671_v10 = vpop.f32.mrf.mxu1 }
 0x30d   : > { %752 = vst [vmem:[#allocation3 + $0x38] sm:$0xff] %v744_v1  ;;  %v747_v19 = vadd.f32 %v671_v10, %v647_v23  ;;  %v740_v3 = vpop.f32.mrf.mxu0 }
 0x30e   : > { %753 = vst [vmem:[#allocation3 + $0x8] sm:$0xff] %v745_v9  ;;  %v750_v7 = vadd.f32 %v740_v3, %v650_v8 }
 0x30f   : > { %755 = vst [vmem:[#allocation3 + $0x20] sm:$0xff] %v747_v19 }
 0x310   : > { %758 = vst [vmem:[#allocation3 + $0x28] sm:$0xff] %v750_v7 }
 0x312   : > { %v694_v2 = vpop.f32.mrf.mxu2 }
 0x313   : > { %v748_v4 = vadd.f32 %v694_v2, %v648_v11  ;;  %v717_v5 = vpop.f32.mrf.mxu3 }
 0x314   : > { %v749_v6 = vadd.f32 %v717_v5, %v649_v15 }
 0x315   : > { %756 = vst [vmem:[#allocation3 + $0x10] sm:$0xff] %v748_v4 }
 0x316   : > { %757 = vst [vmem:[#allocation3 + $0x30] sm:$0xff] %v749_v6 }
 0x317 PF: > { %p759_p11 = scmp.eq.s32.totalorder %s2127_s10, 1 }
 0x319   : > { %p760_p12 = pnand %p759_p11, %p582_p8 }
 0x31b   : > { %763 = sbr.rel (%p760_p12) target bundleno = 1078 (0x436), region = 56 }
 0x320   : > { %v767_v12 = vld [vmem:[#allocation2] sm:$0xff]  ;;  %v766_v13 = vld [vmem:[#allocation2 + $0x10] sm:$0xff]  ;;  %815 = vmatpush.msra.mxu1 %v1539_v60  ;;  %838 = vmatpush.msra.mxu2 %v1542_v61  ;;  %vm768_vm2 = vcmask 130048  }
 0x321   : > { %789 = vmatpush.msra.mxu0 %v767_v12  ;;  %v764_v14 = vld [vmem:[%s2015_s0] sm:$0xff]  ;;  %861 = vmatpush.msra.mxu3 %v1545_v62  ;;  %v813_v23 = vld [vmem:[#allocation3 + $0x30] sm:$0xff] }
 0x322   : > { %816 = vmatpush.msra.mxu1 %v1527_v56  ;;  %839 = vmatpush.msra.mxu2 %v1530_v57  ;;  %v814_v57 = vld [vmem:[#allocation3 + $0x28] sm:$0xff] }
 0x323   : > { %790 = vmatpush.msra.mxu0 %v766_v13  ;;  %862 = vmatpush.msra.mxu3 %v1533_v58 }
 0x324   : > { %1158 = vmatmul.msk.f32.vlgmr.msra.gmra.mxu0 %vm768_vm2, %v764_v14  ;;  %817 = vmatpush.msra.mxu1 %v1515_v52  ;;  %v765_v52 = vld [vmem:[%s2015_s0 + $0x8] sm:$0xff] }
 0x325   : > { %884 = vmatpush.msrb.mxu0 %v1548_v63  ;;  %840 = vmatpush.msra.mxu2 %v1518_v53  ;;  %v812_v63 = vld [vmem:[#allocation3 + $0x10] sm:$0xff] }
 0x326   : > { %863 = vmatpush.msra.mxu3 %v1521_v54  ;;  %818 = vmatpush.msra.mxu1 %v1503_v48  ;;  %v811_v54 = vld [vmem:[#allocation3 + $0x20] sm:$0xff] }
 0x327   : > { %885 = vmatpush.msrb.mxu0 %v1536_v59  ;;  %841 = vmatpush.msra.mxu2 %v1506_v49 }
 0x328   : > { %864 = vmatpush.msra.mxu3 %v1509_v50  ;;  %819 = vmatpush.msra.mxu1 %v1491_v44  ;;  %v807_v44 = vld [vmem:[#allocation3] sm:$0xff]  ;;  %v808_v50 = vld [vmem:[#allocation3 + $0x38] sm:$0xff] }
 0x329   : > { %886 = vmatpush.msrb.mxu0 %v1524_v55  ;;  %842 = vmatpush.msra.mxu2 %v1494_v45  ;;  %v810_v45 = vld [vmem:[#allocation3 + $0x18] sm:$0xff] }
 0x32a   : > { %865 = vmatpush.msra.mxu3 %v1497_v46  ;;  %820 = vmatpush.msra.mxu1 %v1479_v40 }
 0x32b   : > { %887 = vmatpush.msrb.mxu0 %v1512_v51  ;;  %843 = vmatpush.msra.mxu2 %v1482_v41  ;;  %v802_v41 = vld [vmem:[#allocation2 + $0x8] sm:$0xff] }
 0x32c   : > { %1159 = vmatmul.msk.f32.gmra.mxu0 %vm768_vm2, %v765_v52  ;;  %866 = vmatpush.msra.mxu3 %v1485_v42  ;;  %v809_v51 = vld [vmem:[#allocation3 + $0x8] sm:$0xff] }
 0x32d   : > { %888 = vmatpush.msrb.mxu0 %v1500_v47  ;;  %821 = vmatpush.msra.mxu1 %v1467_v36 }
 0x32e   : > { %844 = vmatpush.msra.mxu2 %v1470_v37  ;;  %867 = vmatpush.msra.mxu3 %v1473_v38  ;;  %v801_v37 = vld [vmem:[#allocation2 + $0x18] sm:$0xff] }
 0x32f   : > { %889 = vmatpush.msrb.mxu0 %v1488_v43  ;;  %822 = vmatpush.msra.mxu1 %v1455_v32  ;;  %v2104_v32 = vld [vmem:[#allocation11_spill] sm:$0xff] }
 0x330   : > { %845 = vmatpush.msra.mxu2 %v1458_v33  ;;  %868 = vmatpush.msra.mxu3 %v1461_v34  ;;  %v2105_v33 = vld [vmem:[#allocation12_spill] sm:$0xff]  ;;  %v2106_v34 = vld [vmem:[#allocation17_spill] sm:$0xff] }
 0x331   : > { %890 = vmatpush.msrb.mxu0 %v1476_v39  ;;  %823 = vmatpush.msra.mxu1 %v1443_v28  ;;  %v2093_v28 = vld [vmem:[#allocation24_spill] sm:$0xff] }
 0x332   : > { %846 = vmatpush.msra.mxu2 %v1446_v29  ;;  %869 = vmatpush.msra.mxu3 %v1449_v30  ;;  %v2101_v29 = vld [vmem:[#allocation16_spill] sm:$0xff]  ;;  %v2102_v30 = vld [vmem:[#allocation21_spill] sm:$0xff] }
 0x333   : > { %891 = vmatpush.msrb.mxu0 %v1464_v35  ;;  %824 = vmatpush.msra.mxu1 %v1431_v24  ;;  %v2090_v24 = vld [vmem:[#allocation27_spill] sm:$0xff]  ;;  %v2107_v35 = vld [vmem:[#allocation13_spill] sm:$0xff] }
 0x334   : > { %847 = vmatpush.msra.mxu2 %v1434_v25  ;;  %870 = vmatpush.msra.mxu3 %v1437_v26  ;;  %v2091_v25 = vld [vmem:[#allocation22_spill] sm:$0xff]  ;;  %v2092_v26 = vld [vmem:[#allocation23_spill] sm:$0xff] }
 0x335   : > { %892 = vmatpush.msrb.mxu0 %v1452_v31  ;;  %825 = vmatpush.msra.mxu1 %v1419_v20  ;;  %v2094_v20 = vld [vmem:[#allocation26_spill] sm:$0xff] }
 0x336   : > { %848 = vmatpush.msra.mxu2 %v1422_v21  ;;  %871 = vmatpush.msra.mxu3 %v1425_v22  ;;  %v2095_v21 = vld [vmem:[#allocation18_spill] sm:$0xff]  ;;  %v2096_v22 = vld [vmem:[#allocation19_spill] sm:$0xff] }
 0x337   : > { %893 = vmatpush.msrb.mxu0 %v1440_v27  ;;  %826 = vmatpush.msra.mxu1 %v1407_v16  ;;  %v2097_v27 = vld [vmem:[#allocation20_spill] sm:$0xff]  ;;  %v2098_v16 = vld [vmem:[#allocation25_spill] sm:$0xff]  ;;  %v2103_v31 = vld [vmem:[#allocation10_spill] sm:$0xff] }
 0x338   : > { %849 = vmatpush.msra.mxu2 %v1410_v17  ;;  %872 = vmatpush.msra.mxu3 %v1413_v18  ;;  %v2099_v17 = vld [vmem:[#allocation14_spill] sm:$0xff]  ;;  %v2100_v18 = vld [vmem:[#allocation15_spill] sm:$0xff] }
 0x339   : > { %894 = vmatpush.msrb.mxu0 %v2090_v24  ;;  %827 = vmatpush.msra.mxu1 %v2091_v25 }
 0x33a   : > { %850 = vmatpush.msra.mxu2 %v2092_v26  ;;  %873 = vmatpush.msra.mxu3 %v2093_v28 }
 0x33b   : > { %895 = vmatpush.msrb.mxu0 %v2094_v20  ;;  %828 = vmatpush.msra.mxu1 %v2095_v21 }
 0x33c   : > { %851 = vmatpush.msra.mxu2 %v2096_v22  ;;  %874 = vmatpush.msra.mxu3 %v2097_v27 }
 0x33d   : > { %896 = vmatpush.msrb.mxu0 %v2098_v16  ;;  %829 = vmatpush.msra.mxu1 %v2099_v17 }
 0x33e   : > { %852 = vmatpush.msra.mxu2 %v2100_v18  ;;  %875 = vmatpush.msra.mxu3 %v2101_v29 }
 0x33f   : > { %897 = vmatpush.msrb.mxu0 %v2102_v30  ;;  %830 = vmatpush.msra.mxu1 %v2103_v31 }
 0x340   : > { %853 = vmatpush.msra.mxu2 %v2104_v32  ;;  %876 = vmatpush.msra.mxu3 %v2105_v33 }
 0x341   : > { %898 = vmatpush.msrb.mxu0 %v2106_v34 }
 0x343   : > { %899 = vmatpush.msrb.mxu0 %v2107_v35 }
 0x3a1   : > { %v792_v36 = vpop.f32.mrf.mxu0 }
 0x3a2   : > { %v798_v38 = vmul.f32 2.0, %v792_v36 }
 0x3a4   : > { %v803_v39 = vsub.f32 %v798_v38, %v801_v37 }
 0x3a6   : > { %805 = vst [vmem:[#allocation2 + $0x18] sm:$0xff] %v803_v39  ;;  %831 = vmatmul.f32.vlgmr.msra.gmra.mxu1 %v803_v39  ;;  %854 = vmatmul.f32.vlgmr.msra.gmra.mxu2 %v803_v39 }
 0x3a7   : > { %877 = vmatmul.f32.vlgmr.msra.gmra.mxu3 %v803_v39  ;;  %900 = vmatmul.f32.vlgmr.msrb.gmra.mxu0 %v803_v39 }
 0x3a9   : > { %v795_v40 = vpop.f32.mrf.mxu0 }
 0x3aa   : > { %v799_v42 = vmul.f32 2.0, %v795_v40 }
 0x3ac   : > { %v804_v43 = vsub.f32 %v799_v42, %v802_v41 }
 0x3ae   : > { %806 = vst [vmem:[#allocation2 + $0x8] sm:$0xff] %v804_v43  ;;  %834 = vmatmul.f32.gmra.mxu1 %v804_v43  ;;  %857 = vmatmul.f32.gmra.mxu2 %v804_v43 }
 0x3af   : > { %880 = vmatmul.f32.gmra.mxu3 %v804_v43  ;;  %903 = vmatmul.f32.gmra.mxu0 %v804_v43 }
 0x423   : > { %v832_v46 = vpop.f32.mrf.mxu1 }
 0x424   : > { %v907_v47 = vadd.f32 %v832_v46, %v807_v44  ;;  %v901_v48 = vpop.f32.mrf.mxu0 }
 0x425   : > { %v910_v49 = vadd.f32 %v901_v48, %v810_v45 }
 0x426   : > { %915 = vst [vmem:[#allocation3] sm:$0xff] %v907_v47 }
 0x427   : > { %918 = vst [vmem:[#allocation3 + $0x18] sm:$0xff] %v910_v49 }
 0x429   : > { %v855_v53 = vpop.f32.mrf.mxu2 }
 0x42a   : > { %v908_v55 = vadd.f32 %v855_v53, %v808_v50  ;;  %v878_v56 = vpop.f32.mrf.mxu3 }
 0x42b   : > { %v909_v58 = vadd.f32 %v878_v56, %v809_v51  ;;  %v835_v59 = vpop.f32.mrf.mxu1 }
 0x42c   : > { %916 = vst [vmem:[#allocation3 + $0x38] sm:$0xff] %v908_v55  ;;  %v911_v60 = vadd.f32 %v835_v59, %v811_v54  ;;  %v904_v61 = vpop.f32.mrf.mxu0 }
 0x42d   : > { %917 = vst [vmem:[#allocation3 + $0x8] sm:$0xff] %v909_v58  ;;  %v914_v62 = vadd.f32 %v904_v61, %v814_v57 }
 0x42e   : > { %919 = vst [vmem:[#allocation3 + $0x20] sm:$0xff] %v911_v60 }
 0x42f   : > { %922 = vst [vmem:[#allocation3 + $0x28] sm:$0xff] %v914_v62 }
 0x431   : > { %v858_v1 = vpop.f32.mrf.mxu2 }
 0x432   : > { %v912_v0 = vadd.f32 %v858_v1, %v812_v63  ;;  %v881_v8 = vpop.f32.mrf.mxu3 }
 0x433   : > { %v913_v9 = vadd.f32 %v881_v8, %v813_v23 }
 0x434   : > { %920 = vst [vmem:[#allocation3 + $0x10] sm:$0xff] %v912_v0 }
 0x435   : > { %921 = vst [vmem:[#allocation3 + $0x30] sm:$0xff] %v913_v9 }
 0x436 PF: > { %p1160_p13 = scmp.ne.s32.totalorder %s1347_s22, 3 }
 0x438   : > { %926 = sbr.rel (%p1160_p13) target bundleno = 1133 (0x46d), region = 60 }
 0x43d   : > { %v927_v10 = vld [vmem:[#allocation3] sm:$0xff]  ;;  %v928_v19 = vld [vmem:[#allocation3 + $0x38] sm:$0xff]  ;;  %v932_v15 = vld [vmem:[#allocation3 + $0x10] sm:$0xff] }
 0x43e   : > { %v1161_v3 = vmul.f32 -1.442695, %v927_v10  ;;  %v1163_v7 = vmul.f32 -1.442695, %v928_v19  ;;  %v931_v11 = vld [vmem:[#allocation3 + $0x20] sm:$0xff]  ;;  %v929_v5 = vld [vmem:[#allocation3 + $0x8] sm:$0xff] }
 0x43f   : > { %v1162_v2 = vmul.f32 -1.442695, %v931_v11  ;;  %v1164_v4 = vmul.f32 -1.442695, %v932_v15  ;;  %v1165_v6 = vmul.f32 -1.442695, %v929_v5 }
 0x440   : > { %1198 = vpow2.f32 %v1161_v3  ;;  %v933_v12 = vld [vmem:[#allocation3 + $0x30] sm:$0xff]  ;;  %v930_v26 = vld [vmem:[#allocation3 + $0x18] sm:$0xff]  ;;  %v934_v21 = vld [vmem:[#allocation3 + $0x28] sm:$0xff] }
 0x441   : > { %1200 = vpow2.f32 %v1163_v7  ;;  %v1166_v13 = vmul.f32 -1.442695, %v933_v12  ;;  %v1053_v0 = vld [vmem:[%s2017_s2] sm:$0xff] }
 0x442   : > { %1202 = vpow2.f32 %v1162_v2 }
 0x443   : > { %1204 = vpow2.f32 %v1164_v4 }
 0x444   : > { %1206 = vpow2.f32 %v1165_v6 }
 0x445   : > { %1208 = vpow2.f32 %v1166_v13 }
 0x446   : > { %v1199_v14 = vpop.eup %1198 }
 0x447   : > { %v1201_v52 = vpop.eup %1200  ;;  %v941_v24 = vadd.f32 1.0, %v1199_v14 }
 0x448   : > { %v1203_v25 = vpop.eup %1202  ;;  %v979_v28 = vadd.f32 1.0, %v1201_v52 }
 0x449   : > { %v1205_v20 = vpop.eup %1204  ;;  %1210 = vrcp.f32 %v941_v24  ;;  %v952_v27 = vand.u32 2147483647, %v941_v24  ;;  %v1889_v16 = vadd.f32 1.0, %v1203_v25  ;;  %v954_v18 = vand.u32 2147483648, %v941_v24 }
 0x44a   : > { %1212 = vrcp.f32 %v979_v28  ;;  %v1207_v22 = vpop.eup %1206  ;;  %v1891_v17 = vadd.f32 1.0, %v1205_v20  ;;  %v990_v29 = vand.u32 2147483647, %v979_v28  ;;  %v992_v31 = vand.u32 2147483648, %v979_v28 }
 0x44b   : > { %1214 = vtanh.f32 %v930_v26  ;;  %v1893_v30 = vadd.f32 1.0, %v1207_v22  ;;  %v1209_v32 = vpop.eup %1208  ;;  %vm948_vm3 = vweird.f32 %v941_v24  ;;  %vm1897_vm4 = vcmp.eq.f32.partialorder %v952_v27, 8.507059e+37  ;;  %v1054_v26 = vld [vmem:[%s2017_s2 + $0x8] sm:$0xff] }
 0x44c   : > { %1216 = vtanh.f32 %v934_v21  ;;  %vm986_vm5 = vweird.f32 %v979_v28  ;;  %v955_v37 = vor.u32 1.1754944e-38, %v954_v18  ;;  %vm1902_vm6 = vcmp.eq.f32.partialorder %v990_v29, 8.507059e+37 }
 0x44d   : > { %1218 = vrcp.f32 %v1889_v16  ;;  %v967_v39 = vand.u32 2147483647, %v1889_v16  ;;  %v993_v42 = vor.u32 1.1754944e-38, %v992_v31  ;;  %vm963_vm7 = vweird.f32 %v1889_v16 }
 0x44e   : > { %1220 = vrcp.f32 %v1891_v17  ;;  %v969_v43 = vand.u32 2147483648, %v1889_v16  ;;  %vm1001_vm9 = vweird.f32 %v1891_v17  ;;  %v1912_v46 = vadd.f32 1.0, %v1209_v32 }
 0x44f   : > { %v1211_v33 = vpop.eup %1210  ;;  %1222 = vrcp.f32 %v1893_v30  ;;  %v1005_v49 = vand.u32 2147483647, %v1891_v17  ;;  %v1007_v50 = vand.u32 2147483648, %v1891_v17  ;;  %vm1917_vm11 = vcmp.eq.f32.partialorder %v967_v39, 8.507059e+37 }
 0x450   : > { %v1213_v35 = vpop.eup %1212  ;;  %v944_v36 = vmul.f32 %v1211_v33, %v941_v24  ;;  %vm949_vm8 = vweird.f32 %v1211_v33  ;;  %1224 = vrcp.f32 %v1912_v46  ;;  %v970_v59 = vor.u32 1.1754944e-38, %v969_v43 }
 0x451   : > { %v1215_v40 = vpop.eup %1214  ;;  %v982_v41 = vmul.f32 %v1213_v35, %v979_v28  ;;  %vm987_vm10 = vweird.f32 %v1213_v35  ;;  %vm1925_vm12 = vmor %vm948_vm3, %vm949_vm8  ;;  %vm1024_vm13 = vweird.f32 %v1893_v30  ;;  %v1008_v9 = vor.u32 1.1754944e-38, %v1007_v50 }
 0x452   : > { %v1909_v44 = vpop.eup %1216  ;;  %v945_v45 = vsub.f32 1.0, %v944_v36  ;;  %vm1933_vm14 = vmor %vm986_vm5, %vm987_vm10  ;;  %v1030_v7 = vand.u32 2147483648, %v1893_v30  ;;  %v1028_v22 = vand.u32 2147483647, %v1893_v30  ;;  %v1045_v36 = vand.u32 2147483648, %v1912_v46 }
 0x453   : > { %v1219_v47 = vpop.eup %1218  ;;  %v983_v48 = vsub.f32 1.0, %v982_v41 }
 0x454   : > { %v1221_v51 = vpop.eup %1220  ;;  %v946_v53 = vmul.f32 %v1211_v33, %v945_v45  ;;  %v959_v54 = vmul.f32 %v1219_v47, %v1889_v16  ;;  %vm964_vm15 = vweird.f32 %v1219_v47  ;;  %v1031_v27 = vor.u32 1.1754944e-38, %v1030_v7 }
 0x455   : > { %v1922_v56 = vpop.eup %1222  ;;  %v984_v58 = vmul.f32 %v1213_v35, %v983_v48  ;;  %v997_v60 = vmul.f32 %v1221_v51, %v1891_v17  ;;  %vm1002_vm0 = vweird.f32 %v1221_v51  ;;  %vm1951_vm1 = vmor %vm963_vm7, %vm964_vm15  ;;  %vm1029_vm8 = vcmp.eq.f32.partialorder %v1028_v22, 8.507059e+37 }
 0x456   : > { %v947_v61 = vadd.f32 %v1211_v33, %v946_v53  ;;  %v960_v63 = vsub.f32 1.0, %v959_v54  ;;  %v1020_v23 = vmul.f32 %v1922_v56, %v1893_v30  ;;  %vm1025_vm2 = vweird.f32 %v1922_v56  ;;  %v1225_v5 = vpop.eup %1224  ;;  %vm1961_vm3 = vmor %vm1001_vm9, %vm1002_vm0 }
 0x457   : > { %v985_v1 = vadd.f32 %v1213_v35, %v984_v58  ;;  %v998_v8 = vsub.f32 1.0, %v997_v60  ;;  %v1035_v28 = vmul.f32 %v1225_v5, %v1912_v46  ;;  %vm1982_vm5 = vmor %vm1024_vm13, %vm1025_vm2  ;;  %vm1040_vm7 = vweird.f32 %v1225_v5 }
 0x458   : > { %v951_v10 = vsel %vm1925_vm12, %v1211_v33, %v947_v61  ;;  %v961_v19 = vmul.f32 %v1219_v47, %v960_v63  ;;  %v1021_v3 = vsub.f32 1.0, %v1020_v23  ;;  %v1046_v41 = vor.u32 1.1754944e-38, %v1045_v36 }
 0x459   : > { %v956_v11 = vsel %vm1897_vm4, %v955_v37, %v951_v10  ;;  %v989_v15 = vsel %vm1933_vm14, %v1213_v35, %v985_v1  ;;  %v999_v4 = vmul.f32 %v1221_v51, %v998_v8  ;;  %vm1006_vm4 = vcmp.eq.f32.partialorder %v1005_v49, 8.507059e+37 }
 0x45a   : > { %v994_v6 = vsel %vm1902_vm6, %v993_v42, %v989_v15  ;;  %v1055_v12 = vmul.f32 %v1053_v0, %v956_v11  ;;  %v962_v13 = vadd.f32 %v1219_v47, %v961_v19  ;;  %v1022_v52 = vmul.f32 %v1922_v56, %v1021_v3 }
 0x45b   : > { %v1051_v24 = vmul.f32 %v1215_v40, %v994_v6  ;;  %v1000_v25 = vadd.f32 %v1221_v51, %v999_v4  ;;  %v1036_v31 = vsub.f32 1.0, %v1035_v28  ;;  %vm1039_vm6 = vweird.f32 %v1912_v46 }
 0x45c   : > { %v966_v20 = vsel %vm1951_vm1, %v1219_v47, %v962_v13  ;;  %v1023_v21 = vadd.f32 %v1922_v56, %v1022_v52  ;;  %v1043_v37 = vand.u32 2147483647, %v1912_v46  ;;  %vm1041_vm9 = vmor %vm1039_vm6, %vm1040_vm7 }
 0x45d   : > { %v1057_v16 = vadd.f32 %v1055_v12, %v1051_v24  ;;  %v971_v17 = vsel %vm1917_vm11, %v970_v59, %v966_v20  ;;  %v1004_v18 = vsel %vm1961_vm3, %v1221_v51, %v1000_v25  ;;  %v1037_v35 = vmul.f32 %v1225_v5, %v1036_v31 }
 0x45e   : > { %v1009_v32 = vsel %vm1006_vm4, %v1008_v9, %v1004_v18  ;;  %v1056_v33 = vmul.f32 %v1054_v26, %v971_v17  ;;  %v1027_v30 = vsel %vm1982_vm5, %v1922_v56, %v1023_v21  ;;  %vm1044_vm10 = vcmp.eq.f32.partialorder %v1043_v37, 8.507059e+37 }
 0x45f   : > { %1059 = vst [vmem:[#allocation6] sm:$0xff] %v1057_v16  ;;  %1226 = vtanh.f32 %v1057_v16  ;;  %v1052_v34 = vmul.f32 %v1909_v44, %v1009_v32  ;;  %v1038_v39 = vadd.f32 %v1225_v5, %v1037_v35  ;;  %v1032_v40 = vsel %vm1029_vm8, %v1031_v27, %v1027_v30 }
 0x461   : > { %v1058_v38 = vadd.f32 %v1056_v33, %v1052_v34  ;;  %v1042_v42 = vsel %vm1041_vm9, %v1225_v5, %v1038_v39 }
 0x462   : > { %v1047_v45 = vsel %vm1044_vm10, %v1046_v41, %v1042_v42 }
 0x463   : > { %1060 = vst [vmem:[#allocation6 + $0x8] sm:$0xff] %v1058_v38  ;;  %1228 = vtanh.f32 %v1058_v38 }
 0x465   : > { %v1227_v43 = vpop.eup %1226 }
 0x466   : > { %v1063_v44 = vmul.f32 %v1227_v43, %v1032_v40 }
 0x468   : > { %1065 = vst [vmem:[#allocation4] sm:$0xff] %v1063_v44 }
 0x469   : > { %v1229_v47 = vpop.eup %1228 }
 0x46a   : > { %v1064_v48 = vmul.f32 %v1229_v47, %v1047_v45 }
 0x46c   : > { %1066 = vst [vmem:[#allocation4 + $0x8] sm:$0xff] %v1064_v48 }
 0x46d PF: > { %p1182_p0 = scmp.eq.s32.totalorder %s1347_s22, 3  ;;  %s1302_s25 = smov [#allocation4]  }
 0x46e   : > { %s1072_s26 = sshll.u32 %s1302_s25, 4  ;;  %s1074_s29 = sshll.u32 %s2020_s5, 4  ;;  %s1073_s26 = int_to_ptr.vmem [resolvable:$true] %s1072_s26  ;;  %s1075_s29 = int_to_ptr.hbm [resolvable:$true] %s1074_s29 }
 0x46f   : > { %s1303_s30 = smov 128   ;;  %s1304_s7 = smov 8  }
 0x470   : > { %1175 = dma.vmem_to_hbm [thread:$0]  (%p1182_p0), %s1073_s26, 256, %s1075_s29, [#allocation5], %s1303_s30, %s1303_s30, %s1304_s7  }
 0x471   : > { %s1088_s10 = sshll.u32 %s2021_s6, 4  ;;  %s1305_s11 = smov [#allocation6]   ;;  %s1089_s10 = int_to_ptr.hbm [resolvable:$true] %s1088_s10 }
 0x472   : > { %s1086_s12 = sshll.u32 %s1305_s11, 4  ;;  %s1087_s12 = int_to_ptr.vmem [resolvable:$true] %s1086_s12 }
 0x473   : > { %1177 = dma.vmem_to_hbm [thread:$0]  (%p1182_p0), %s1087_s12, 256, %s1089_s10, [#allocation7], %s1303_s30, %s1303_s30, %s1304_s7  }
 0x474   : > { %1291 = dma.done.wait (%p1182_p0), [#allocation5], 256  }
 0x475   : > { %1293 = vsyncadd (%p1182_p0), [#allocation5], 4294967040 }
 0x476   : > { %1295 = dma.done.wait (%p1182_p0), [#allocation7], 256  }
 0x477   : > { %1297 = vsyncadd (%p1182_p0), [#allocation7], 4294967040 }
 0x478 PF: > { %s19_s21 = sadd.s32 1, %s1300_s21  }
 0x479   : > { %p16_p1 = scmp.ge.s32.totalorder %s19_s21, 6  }
 0x47b   :  { %18 = sbr.rel (!%p16_p1) target bundleno = 2 (0x2), region = 98 }
 0x480   :  { %1110 = vsyncpa [#allocation5], 1 }
 0x481   :  { %1112 = vsyncpa [#allocation5 + $0x1], 1 }
 0x482   :  { %1113 = vsyncpa [#allocation7], 1 }

</bundles_post_ra>
